<compile_context>
chip_gen: v7x
topology: tpu7x:2x2x1
jax: 0.10.0
libtpu: 0.0.40
codegen_flags: <defaults>
</compile_context>

<pallas_src>
import functools

import jax
import jax.numpy as jnp
from jax import lax
from jax.experimental import pallas as pl
from jax.experimental.pallas import tpu as pltpu


# ------------------------------------------------------------------
# Pallas kernel: one bidirectional GRU layer (both directions fused),
# chunked over time. Grid = (T // Tc,) sequential; hidden states for the
# two directions live in a VMEM scratch across grid steps.
# ------------------------------------------------------------------
def _bigru_chunk_kernel(gxf_ref, gxb_ref,            # (Tc, B, 3H) each
                        whf_ref, whb_ref,            # (H, 3H) each
                        bhnf_ref, bhnb_ref,          # (1, H) each
                        of_ref, ob_ref,              # (Tc, B, H) each
                        h_ref,                       # scratch (2, B, H)
                        *, Tc, H):
    g = pl.program_id(0)

    @pl.when(g == 0)
    def _():
        h_ref[...] = jnp.zeros_like(h_ref)

    # Resident weights / biases: load once per chunk (hoisted out of loop).
    whf = whf_ref[...]
    whb = whb_ref[...]
    bhnf = bhnf_ref[...]
    bhnb = bhnb_ref[...]

    def step(s, carry):
        hf, hb = carry
        rb = Tc - 1 - s                               # backward row within chunk

        gxf = gxf_ref[s]                              # (B, 3H)  gx + b_ih + b_h{r,z}
        gxb = gxb_ref[rb]                             # (B, 3H)

        ghf = jnp.dot(hf, whf, preferred_element_type=jnp.float32)   # (B, 3H)
        ghb = jnp.dot(hb, whb, preferred_element_type=jnp.float32)   # (B, 3H)

        # forward direction (PyTorch gate order r, z, n)
        r_f = jax.nn.sigmoid(gxf[:, 0:H] + ghf[:, 0:H])
        z_f = jax.nn.sigmoid(gxf[:, H:2 * H] + ghf[:, H:2 * H])
        n_f = jnp.tanh(gxf[:, 2 * H:3 * H] + r_f * (ghf[:, 2 * H:3 * H] + bhnf))
        hf_new = (1.0 - z_f) * n_f + z_f * hf

        # backward direction
        r_b = jax.nn.sigmoid(gxb[:, 0:H] + ghb[:, 0:H])
        z_b = jax.nn.sigmoid(gxb[:, H:2 * H] + ghb[:, H:2 * H])
        n_b = jnp.tanh(gxb[:, 2 * H:3 * H] + r_b * (ghb[:, 2 * H:3 * H] + bhnb))
        hb_new = (1.0 - z_b) * n_b + z_b * hb

        of_ref[s] = hf_new.astype(of_ref.dtype)
        ob_ref[rb] = hb_new.astype(ob_ref.dtype)
        return hf_new, hb_new

    hf, hb = lax.fori_loop(0, Tc, step, (h_ref[0], h_ref[1]), unroll=True)
    h_ref[0] = hf
    h_ref[1] = hb


def _pick_chunk(T, max_chunk=32):
    """Largest divisor of T that is <= max_chunk (amortize per-step overhead)."""
    for c in range(min(T, max_chunk), 0, -1):
        if T % c == 0:
            return c
    return 1


def bigru_layer(gx_f, gx_b, wh_f, wh_b, bhn_f, bhn_b, *, max_chunk=32):
    """Run one bidirectional GRU layer given precomputed input projections.

    gx_f, gx_b : (T, B, 3H) input-side gate pre-activations (fwd / bwd weights).
    wh_f, wh_b : (H, 3H) fused hidden weights (gate order r, z, n).
    bhn_f, bhn_b : (1, H) hidden bias of the n gate.
    Returns (out_f, out_b), each (T, B, H).
    """
    T, B, G3 = gx_f.shape
    H = G3 // 3
    Tc = _pick_chunk(T, max_chunk)
    nc = T // Tc

    kernel = functools.partial(_bigru_chunk_kernel, Tc=Tc, H=H)
    inv = lambda shape: pl.BlockSpec(shape, lambda g: tuple(0 for _ in shape))

    grid_spec = pltpu.PrefetchScalarGridSpec(
        num_scalar_prefetch=0,
        grid=(nc,),
        in_specs=[
            # forward GX: chunk g; backward GX: time-reversed chunk (no jnp.flip)
            pl.BlockSpec((Tc, B, G3), lambda g: (g, 0, 0)),
            pl.BlockSpec((Tc, B, G3), lambda g: (nc - 1 - g, 0, 0)),
            inv((H, G3)), inv((H, G3)),        # fused hidden weights (grid-invariant)
            inv((1, H)), inv((1, H)),          # b_hn fwd / bwd
        ],
        out_specs=[
            pl.BlockSpec((Tc, B, H), lambda g: (g, 0, 0)),
            pl.BlockSpec((Tc, B, H), lambda g: (nc - 1 - g, 0, 0)),
        ],
        scratch_shapes=[pltpu.VMEM((2, B, H), jnp.float32)],
    )

    return pl.pallas_call(
        kernel,
        out_shape=(jax.ShapeDtypeStruct((T, B, H), jnp.float32),
                   jax.ShapeDtypeStruct((T, B, H), jnp.float32)),
        grid_spec=grid_spec,
        compiler_params=pltpu.CompilerParams(
            dimension_semantics=("arbitrary",)),   # recurrence: sequential grid
    )(gx_f, gx_b, wh_f, wh_b, bhn_f, bhn_b)


# ------------------------------------------------------------------
# Weight preparation (done once, outside the hot path)
# ------------------------------------------------------------------
def prepare_direction(w_ih, w_hh, b_ih, b_hh):
    """Convert PyTorch-layout GRU params to fused kernel layout."""
    H = w_hh.shape[1]
    wi = w_ih.T                                   # (D, 3H), gate order r, z, n
    wh = w_hh.T                                   # (H, 3H)
    # Fold b_hr, b_hz into the input projection bias; only b_hn stays separate
    # (it sits inside r * (h @ W_hn + b_hn)).
    b_proj = b_ih + jnp.concatenate(
        [b_hh[0:H], b_hh[H:2 * H], jnp.zeros((H,), b_hh.dtype)])
    b_hn = b_hh[2 * H:3 * H].reshape(1, H)
    return {"wi": wi, "wh": wh, "b_proj": b_proj, "b_hn": b_hn}


def prepare_params(params):
    return [{"fwd": prepare_direction(*l["fwd"]),
             "bwd": prepare_direction(*l["bwd"])} for l in params]


def _input_projection(parts, wi, b_proj):
    """GX = concat(parts, -1) @ wi + b_proj, without materializing the concat."""
    off = 0
    acc = None
    for p in parts:
        d = p.shape[-1]
        c = jnp.einsum("tbd,dg->tbg", p, wi[off:off + d],
                       precision=lax.Precision.HIGHEST)
        acc = c if acc is None else acc + c
        off += d
    return acc + b_proj


# ------------------------------------------------------------------
# Encoder forward: stacked bidirectional GRU + dropout (eval -> identity)
# ------------------------------------------------------------------
def encoder_forward(x, prepared):
    parts = [x]
    for layer in prepared:
        f, b = layer["fwd"], layer["bwd"]
        gx_f = _input_projection(parts, f["wi"], f["b_proj"])
        gx_b = _input_projection(parts, b["wi"], b["b_proj"])
        out_f, out_b = bigru_layer(gx_f, gx_b,
                                   f["wh"], b["wh"],
                                   f["b_hn"], b["b_hn"])
        parts = [out_f, out_b]          # next layer consumes the split directly
    out = jnp.concatenate(parts, axis=-1)   # single concat for the final output
    # nn.Dropout in eval mode is identity.
    # TODO(synk): training-mode dropout (mask * 1/(1-p)) via pltpu.prng_* if needed.
    return out


# ------------------------------------------------------------------
# Pure-JAX reference (lax.scan, PyTorch semantics) for correctness check
# ------------------------------------------------------------------
def _gru_ref_one_direction(x, w_ih, w_hh, b_ih, b_hh):
    H = w_hh.shape[1]

    def step(h, x_t):
        gi = x_t @ w_ih.T + b_ih
        gh = h @ w_hh.T + b_hh
        r = jax.nn.sigmoid(gi[:, 0:H] + gh[:, 0:H])
        z = jax.nn.sigmoid(gi[:, H:2 * H] + gh[:, H:2 * H])
        n = jnp.tanh(gi[:, 2 * H:3 * H] + r * gh[:, 2 * H:3 * H])
        h_new = (1.0 - z) * n + z * h
        return h_new, h_new

    h0 = jnp.zeros((x.shape[1], H), jnp.float32)
    _, out = lax.scan(step, h0, x)
    return out


def encoder_ref(x, params):
    h = x
    for layer in params:
        out_f = _gru_ref_one_direction(h, *layer["fwd"])
        out_b = jnp.flip(
            _gru_ref_one_direction(jnp.flip(h, axis=0), *layer["bwd"]), axis=0)
        h = jnp.concatenate([out_f, out_b], axis=-1)
    return h


# ------------------------------------------------------------------
# Deterministic parameter init (PyTorch-style uniform(-1/sqrt(H), 1/sqrt(H)))
# ------------------------------------------------------------------
def init_params(key, input_size, hidden_size, num_layers):
    k = 1.0 / jnp.sqrt(hidden_size)
    params = []
    d_in = input_size
    for _ in range(num_layers):
        layer = {}
        for dirname in ("fwd", "bwd"):
            key, k1, k2, k3, k4 = jax.random.split(key, 5)
            w_ih = jax.random.uniform(k1, (3 * hidden_size, d_in),
                                      jnp.float32, -k, k)
            w_hh = jax.random.uniform(k2, (3 * hidden_size, hidden_size),
                                      jnp.float32, -k, k)
            b_ih = jax.random.uniform(k3, (3 * hidden_size,), jnp.float32, -k, k)
            b_hh = jax.random.uniform(k4, (3 * hidden_size,), jnp.float32, -k, k)
            layer[dirname] = (w_ih, w_hh, b_ih, b_hh)
        params.append(layer)
        d_in = 2 * hidden_size   # bidirectional: next layer input is 2H
    return params


if __name__ == "__main__":
    # Small shapes consistent with the module (seq-major (T, B, D) input).
    T, B, D_IN, H, L = 8, 2, 32, 16, 2

    key = jax.random.PRNGKey(0)
    key, kx = jax.random.split(key)
    x = jax.random.normal(kx, (T, B, D_IN), jnp.float32)
    params = init_params(key, D_IN, H, L)
    prepared = prepare_params(params)

    enc = jax.jit(encoder_forward)
    out = jax.block_until_ready(enc(x, prepared))

    ref = encoder_ref(x, params)
    assert out.shape == (T, B, 2 * H), out.shape
    err = float(jnp.max(jnp.abs(out - ref)))
    assert err < 1e-4, err

    print("KERNEL_OK")
</pallas_src>

<mosaic_0001>
module attributes {stable_mosaic.version = 11 : i64} {
  func.func @_bigru_chunk_kernel(%arg0: i32, %arg1: memref<8x2x48xf32, #tpu.memory_space<vmem>>, %arg2: memref<8x2x48xf32, #tpu.memory_space<vmem>>, %arg3: memref<16x48xf32, #tpu.memory_space<vmem>>, %arg4: memref<16x48xf32, #tpu.memory_space<vmem>>, %arg5: memref<1x16xf32, #tpu.memory_space<vmem>>, %arg6: memref<1x16xf32, #tpu.memory_space<vmem>>, %arg7: memref<8x2x16xf32, #tpu.memory_space<vmem>>, %arg8: memref<8x2x16xf32, #tpu.memory_space<vmem>>, %arg9: memref<2x2x16xf32, #tpu.memory_space<vmem>>) attributes {dimension_semantics = [#tpu.dimension_semantics<arbitrary>], iteration_bounds = array<i64: 1>, scalar_prefetch = 0 : i64, scratch_operands = 1 : i64, tpu.core_type = #tpu.core_type<tc>, window_params = [{transform_indices = @transform_0, window_bounds = array<i64: 8, 2, 48>}, {transform_indices = @transform_1, window_bounds = array<i64: 8, 2, 48>}, {pipeline_mode = #tpu.pipeline_mode<synchronous>, transform_indices = @transform_2, window_bounds = array<i64: 16, 48>}, {pipeline_mode = #tpu.pipeline_mode<synchronous>, transform_indices = @transform_3, window_bounds = array<i64: 16, 48>}, {pipeline_mode = #tpu.pipeline_mode<synchronous>, transform_indices = @transform_4, window_bounds = array<i64: 1, 16>}, {pipeline_mode = #tpu.pipeline_mode<synchronous>, transform_indices = @transform_5, window_bounds = array<i64: 1, 16>}, {transform_indices = @transform_6, window_bounds = array<i64: 8, 2, 16>}, {transform_indices = @transform_7, window_bounds = array<i64: 8, 2, 16>}]} {
    %c0_i32 = arith.constant 0 : i32
    %0 = arith.cmpi eq, %arg0, %c0_i32 : i32
    %1 = arith.extui %0 : i1 to i32
    %c0_i32_0 = arith.constant 0 : i32
    %2 = arith.cmpi ne, %1, %c0_i32_0 : i32
    scf.if %2 {
      %cst_155 = arith.constant 0.000000e+00 : f32
      %601 = vector.broadcast %cst_155 : f32 to vector<2x2x16xf32>
      %c0_156 = arith.constant 0 : index
      %c0_157 = arith.constant 0 : index
      %c0_158 = arith.constant 0 : index
      %602 = vector.load %arg9[%c0_156, %c0_157, %c0_158] : memref<2x2x16xf32, #tpu.memory_space<vmem>>, vector<2x2x16xf32>
      tpu.vector_store %arg9[%c0_156, %c0_157, %c0_158], %601 {strides = array<i32>} : memref<2x2x16xf32, #tpu.memory_space<vmem>>, vector<2x2x16xf32>,
    } else {
    }
    %c0 = arith.constant 0 : index
    %c0_1 = arith.constant 0 : index
    %3 = vector.load %arg3[%c0, %c0_1] : memref<16x48xf32, #tpu.memory_space<vmem>>, vector<16x48xf32>
    %c0_2 = arith.constant 0 : index
    %c0_3 = arith.constant 0 : index
    %4 = vector.load %arg4[%c0_2, %c0_3] : memref<16x48xf32, #tpu.memory_space<vmem>>, vector<16x48xf32>
    %c0_4 = arith.constant 0 : index
    %c0_5 = arith.constant 0 : index
    %5 = vector.load %arg5[%c0_4, %c0_5] : memref<1x16xf32, #tpu.memory_space<vmem>>, vector<1x16xf32>
    %c0_6 = arith.constant 0 : index
    %c0_7 = arith.constant 0 : index
    %6 = vector.load %arg6[%c0_6, %c0_7] : memref<1x16xf32, #tpu.memory_space<vmem>>, vector<1x16xf32>
    %c0_8 = arith.constant 0 : index
    %c0_9 = arith.constant 0 : index
    %c0_10 = arith.constant 0 : index
    %7 = vector.load %arg9[%c0_8, %c0_9, %c0_10] : memref<2x2x16xf32, #tpu.memory_space<vmem>>, vector<1x2x16xf32>
    %8 = vector.shape_cast %7 : vector<1x2x16xf32> to vector<2x16xf32>
    %c1 = arith.constant 1 : index
    %c0_11 = arith.constant 0 : index
    %c0_12 = arith.constant 0 : index
    %9 = vector.load %arg9[%c1, %c0_11, %c0_12] : memref<2x2x16xf32, #tpu.memory_space<vmem>>, vector<1x2x16xf32>
    %10 = vector.shape_cast %9 : vector<1x2x16xf32> to vector<2x16xf32>
    %c0_i32_13 = arith.constant 0 : i32
    %c7_i32 = arith.constant 7 : i32
    %11 = arith.subi %c7_i32, %c0_i32_13 : i32
    %12 = arith.index_cast %c0_i32_13 : i32 to index
    %c0_14 = arith.constant 0 : index
    %c0_15 = arith.constant 0 : index
    %13 = vector.load %arg1[%12, %c0_14, %c0_15] : memref<8x2x48xf32, #tpu.memory_space<vmem>>, vector<1x2x48xf32>
    %14 = vector.shape_cast %13 : vector<1x2x48xf32> to vector<2x48xf32>
    %15 = arith.index_cast %11 : i32 to index
    %c0_16 = arith.constant 0 : index
    %c0_17 = arith.constant 0 : index
    %16 = vector.load %arg2[%15, %c0_16, %c0_17] : memref<8x2x48xf32, #tpu.memory_space<vmem>>, vector<1x2x48xf32>
    %17 = vector.shape_cast %16 : vector<1x2x48xf32> to vector<2x48xf32>
    %cst = arith.constant dense<0.000000e+00> : vector<2x48xf32>
    %18 = tpu.matmul %8, %3, %cst {dimension_numbers = #tpu.dot_dimension_numbers<[1], [0], [0], [1], [0, 0, 1, 1], [], []>} : vector<2x16xf32>, vector<16x48xf32>, vector<2x48xf32> -> vector<2x48xf32>
    %cst_18 = arith.constant dense<0.000000e+00> : vector<2x48xf32>
    %19 = tpu.matmul %10, %4, %cst_18 {dimension_numbers = #tpu.dot_dimension_numbers<[1], [0], [0], [1], [0, 0, 1, 1], [], []>} : vector<2x16xf32>, vector<16x48xf32>, vector<2x48xf32> -> vector<2x48xf32>
    %20 = vector.extract_strided_slice %14 {offsets = [0, 0], sizes = [2, 16], strides = [1, 1]} : vector<2x48xf32> to vector<2x16xf32>
    %21 = vector.extract_strided_slice %18 {offsets = [0, 0], sizes = [2, 16], strides = [1, 1]} : vector<2x48xf32> to vector<2x16xf32>
    %22 = arith.addf %20, %21 : vector<2x16xf32>
    %23 = arith.negf %22 : vector<2x16xf32>
    %24 = math.exp %23 : vector<2x16xf32>
    %cst_19 = arith.constant 1.000000e+00 : f32
    %25 = vector.broadcast %cst_19 : f32 to vector<2x16xf32>
    %26 = arith.addf %25, %24 : vector<2x16xf32>
    %27 = arith.divf %25, %26 : vector<2x16xf32>
    %28 = vector.extract_strided_slice %14 {offsets = [0, 16], sizes = [2, 16], strides = [1, 1]} : vector<2x48xf32> to vector<2x16xf32>
    %29 = vector.extract_strided_slice %18 {offsets = [0, 16], sizes = [2, 16], strides = [1, 1]} : vector<2x48xf32> to vector<2x16xf32>
    %30 = arith.addf %28, %29 : vector<2x16xf32>
    %31 = arith.negf %30 : vector<2x16xf32>
    %32 = math.exp %31 : vector<2x16xf32>
    %cst_20 = arith.constant 1.000000e+00 : f32
    %33 = vector.broadcast %cst_20 : f32 to vector<2x16xf32>
    %34 = arith.addf %33, %32 : vector<2x16xf32>
    %35 = arith.divf %33, %34 : vector<2x16xf32>
    %36 = vector.extract_strided_slice %14 {offsets = [0, 32], sizes = [2, 16], strides = [1, 1]} : vector<2x48xf32> to vector<2x16xf32>
    %37 = vector.extract_strided_slice %18 {offsets = [0, 32], sizes = [2, 16], strides = [1, 1]} : vector<2x48xf32> to vector<2x16xf32>
    %38 = vector.broadcast %5 : vector<1x16xf32> to vector<2x16xf32>
    %39 = arith.addf %37, %38 : vector<2x16xf32>
    %40 = arith.mulf %27, %39 : vector<2x16xf32>
    %41 = arith.addf %36, %40 : vector<2x16xf32>
    %42 = math.tanh %41 : vector<2x16xf32>
    %cst_21 = arith.constant 1.000000e+00 : f32
    %43 = vector.broadcast %cst_21 : f32 to vector<2x16xf32>
    %44 = arith.subf %43, %35 : vector<2x16xf32>
    %45 = arith.mulf %44, %42 : vector<2x16xf32>
    %46 = arith.mulf %35, %8 : vector<2x16xf32>
    %47 = arith.addf %45, %46 : vector<2x16xf32>
    %48 = vector.extract_strided_slice %17 {offsets = [0, 0], sizes = [2, 16], strides = [1, 1]} : vector<2x48xf32> to vector<2x16xf32>
    %49 = vector.extract_strided_slice %19 {offsets = [0, 0], sizes = [2, 16], strides = [1, 1]} : vector<2x48xf32> to vector<2x16xf32>
    %50 = arith.addf %48, %49 : vector<2x16xf32>
    %51 = arith.negf %50 : vector<2x16xf32>
    %52 = math.exp %51 : vector<2x16xf32>
    %cst_22 = arith.constant 1.000000e+00 : f32
    %53 = vector.broadcast %cst_22 : f32 to vector<2x16xf32>
    %54 = arith.addf %53, %52 : vector<2x16xf32>
    %55 = arith.divf %53, %54 : vector<2x16xf32>
    %56 = vector.extract_strided_slice %17 {offsets = [0, 16], sizes = [2, 16], strides = [1, 1]} : vector<2x48xf32> to vector<2x16xf32>
    %57 = vector.extract_strided_slice %19 {offsets = [0, 16], sizes = [2, 16], strides = [1, 1]} : vector<2x48xf32> to vector<2x16xf32>
    %58 = arith.addf %56, %57 : vector<2x16xf32>
    %59 = arith.negf %58 : vector<2x16xf32>
    %60 = math.exp %59 : vector<2x16xf32>
    %cst_23 = arith.constant 1.000000e+00 : f32
    %61 = vector.broadcast %cst_23 : f32 to vector<2x16xf32>
    %62 = arith.addf %61, %60 : vector<2x16xf32>
    %63 = arith.divf %61, %62 : vector<2x16xf32>
    %64 = vector.extract_strided_slice %17 {offsets = [0, 32], sizes = [2, 16], strides = [1, 1]} : vector<2x48xf32> to vector<2x16xf32>
    %65 = vector.extract_strided_slice %19 {offsets = [0, 32], sizes = [2, 16], strides = [1, 1]} : vector<2x48xf32> to vector<2x16xf32>
    %66 = vector.broadcast %6 : vector<1x16xf32> to vector<2x16xf32>
    %67 = arith.addf %65, %66 : vector<2x16xf32>
    %68 = arith.mulf %55, %67 : vector<2x16xf32>
    %69 = arith.addf %64, %68 : vector<2x16xf32>
    %70 = math.tanh %69 : vector<2x16xf32>
    %cst_24 = arith.constant 1.000000e+00 : f32
    %71 = vector.broadcast %cst_24 : f32 to vector<2x16xf32>
    %72 = arith.subf %71, %63 : vector<2x16xf32>
    %73 = arith.mulf %72, %70 : vector<2x16xf32>
    %74 = arith.mulf %63, %10 : vector<2x16xf32>
    %75 = arith.addf %73, %74 : vector<2x16xf32>
    %76 = arith.index_cast %c0_i32_13 : i32 to index
    %c0_25 = arith.constant 0 : index
    %c0_26 = arith.constant 0 : index
    %77 = vector.load %arg7[%76, %c0_25, %c0_26] : memref<8x2x16xf32, #tpu.memory_space<vmem>>, vector<1x2x16xf32>
    %78 = vector.shape_cast %77 : vector<1x2x16xf32> to vector<2x16xf32>
    %79 = vector.shape_cast %47 : vector<2x16xf32> to vector<1x2x16xf32>
    tpu.vector_store %arg7[%76, %c0_25, %c0_26], %79 {strides = array<i32>} : memref<8x2x16xf32, #tpu.memory_space<vmem>>, vector<1x2x16xf32>,
    %80 = arith.index_cast %11 : i32 to index
    %c0_27 = arith.constant 0 : index
    %c0_28 = arith.constant 0 : index
    %81 = vector.load %arg8[%80, %c0_27, %c0_28] : memref<8x2x16xf32, #tpu.memory_space<vmem>>, vector<1x2x16xf32>
    %82 = vector.shape_cast %81 : vector<1x2x16xf32> to vector<2x16xf32>
    %83 = vector.shape_cast %75 : vector<2x16xf32> to vector<1x2x16xf32>
    tpu.vector_store %arg8[%80, %c0_27, %c0_28], %83 {strides = array<i32>} : memref<8x2x16xf32, #tpu.memory_space<vmem>>, vector<1x2x16xf32>,
    %c1_i32 = arith.constant 1 : i32
    %c7_i32_29 = arith.constant 7 : i32
    %84 = arith.subi %c7_i32_29, %c1_i32 : i32
    %85 = arith.index_cast %c1_i32 : i32 to index
    %c0_30 = arith.constant 0 : index
    %c0_31 = arith.constant 0 : index
    %86 = vector.load %arg1[%85, %c0_30, %c0_31] : memref<8x2x48xf32, #tpu.memory_space<vmem>>, vector<1x2x48xf32>
    %87 = vector.shape_cast %86 : vector<1x2x48xf32> to vector<2x48xf32>
    %88 = arith.index_cast %84 : i32 to index
    %c0_32 = arith.constant 0 : index
    %c0_33 = arith.constant 0 : index
    %89 = vector.load %arg2[%88, %c0_32, %c0_33] : memref<8x2x48xf32, #tpu.memory_space<vmem>>, vector<1x2x48xf32>
    %90 = vector.shape_cast %89 : vector<1x2x48xf32> to vector<2x48xf32>
    %cst_34 = arith.constant dense<0.000000e+00> : vector<2x48xf32>
    %91 = tpu.matmul %47, %3, %cst_34 {dimension_numbers = #tpu.dot_dimension_numbers<[1], [0], [0], [1], [0, 0, 1, 1], [], []>} : vector<2x16xf32>, vector<16x48xf32>, vector<2x48xf32> -> vector<2x48xf32>
    %cst_35 = arith.constant dense<0.000000e+00> : vector<2x48xf32>
    %92 = tpu.matmul %75, %4, %cst_35 {dimension_numbers = #tpu.dot_dimension_numbers<[1], [0], [0], [1], [0, 0, 1, 1], [], []>} : vector<2x16xf32>, vector<16x48xf32>, vector<2x48xf32> -> vector<2x48xf32>
    %93 = vector.extract_strided_slice %87 {offsets = [0, 0], sizes = [2, 16], strides = [1, 1]} : vector<2x48xf32> to vector<2x16xf32>
    %94 = vector.extract_strided_slice %91 {offsets = [0, 0], sizes = [2, 16], strides = [1, 1]} : vector<2x48xf32> to vector<2x16xf32>
    %95 = arith.addf %93, %94 : vector<2x16xf32>
    %96 = arith.negf %95 : vector<2x16xf32>
    %97 = math.exp %96 : vector<2x16xf32>
    %cst_36 = arith.constant 1.000000e+00 : f32
    %98 = vector.broadcast %cst_36 : f32 to vector<2x16xf32>
    %99 = arith.addf %98, %97 : vector<2x16xf32>
    %100 = arith.divf %98, %99 : vector<2x16xf32>
    %101 = vector.extract_strided_slice %87 {offsets = [0, 16], sizes = [2, 16], strides = [1, 1]} : vector<2x48xf32> to vector<2x16xf32>
    %102 = vector.extract_strided_slice %91 {offsets = [0, 16], sizes = [2, 16], strides = [1, 1]} : vector<2x48xf32> to vector<2x16xf32>
    %103 = arith.addf %101, %102 : vector<2x16xf32>
    %104 = arith.negf %103 : vector<2x16xf32>
    %105 = math.exp %104 : vector<2x16xf32>
    %cst_37 = arith.constant 1.000000e+00 : f32
    %106 = vector.broadcast %cst_37 : f32 to vector<2x16xf32>
    %107 = arith.addf %106, %105 : vector<2x16xf32>
    %108 = arith.divf %106, %107 : vector<2x16xf32>
    %109 = vector.extract_strided_slice %87 {offsets = [0, 32], sizes = [2, 16], strides = [1, 1]} : vector<2x48xf32> to vector<2x16xf32>
    %110 = vector.extract_strided_slice %91 {offsets = [0, 32], sizes = [2, 16], strides = [1, 1]} : vector<2x48xf32> to vector<2x16xf32>
    %111 = vector.broadcast %5 : vector<1x16xf32> to vector<2x16xf32>
    %112 = arith.addf %110, %111 : vector<2x16xf32>
    %113 = arith.mulf %100, %112 : vector<2x16xf32>
    %114 = arith.addf %109, %113 : vector<2x16xf32>
    %115 = math.tanh %114 : vector<2x16xf32>
    %cst_38 = arith.constant 1.000000e+00 : f32
    %116 = vector.broadcast %cst_38 : f32 to vector<2x16xf32>
    %117 = arith.subf %116, %108 : vector<2x16xf32>
    %118 = arith.mulf %117, %115 : vector<2x16xf32>
    %119 = arith.mulf %108, %47 : vector<2x16xf32>
    %120 = arith.addf %118, %119 : vector<2x16xf32>
    %121 = vector.extract_strided_slice %90 {offsets = [0, 0], sizes = [2, 16], strides = [1, 1]} : vector<2x48xf32> to vector<2x16xf32>
    %122 = vector.extract_strided_slice %92 {offsets = [0, 0], sizes = [2, 16], strides = [1, 1]} : vector<2x48xf32> to vector<2x16xf32>
    %123 = arith.addf %121, %122 : vector<2x16xf32>
    %124 = arith.negf %123 : vector<2x16xf32>
    %125 = math.exp %124 : vector<2x16xf32>
    %cst_39 = arith.constant 1.000000e+00 : f32
    %126 = vector.broadcast %cst_39 : f32 to vector<2x16xf32>
    %127 = arith.addf %126, %125 : vector<2x16xf32>
    %128 = arith.divf %126, %127 : vector<2x16xf32>
    %129 = vector.extract_strided_slice %90 {offsets = [0, 16], sizes = [2, 16], strides = [1, 1]} : vector<2x48xf32> to vector<2x16xf32>
    %130 = vector.extract_strided_slice %92 {offsets = [0, 16], sizes = [2, 16], strides = [1, 1]} : vector<2x48xf32> to vector<2x16xf32>
    %131 = arith.addf %129, %130 : vector<2x16xf32>
    %132 = arith.negf %131 : vector<2x16xf32>
    %133 = math.exp %132 : vector<2x16xf32>
    %cst_40 = arith.constant 1.000000e+00 : f32
    %134 = vector.broadcast %cst_40 : f32 to vector<2x16xf32>
    %135 = arith.addf %134, %133 : vector<2x16xf32>
    %136 = arith.divf %134, %135 : vector<2x16xf32>
    %137 = vector.extract_strided_slice %90 {offsets = [0, 32], sizes = [2, 16], strides = [1, 1]} : vector<2x48xf32> to vector<2x16xf32>
    %138 = vector.extract_strided_slice %92 {offsets = [0, 32], sizes = [2, 16], strides = [1, 1]} : vector<2x48xf32> to vector<2x16xf32>
    %139 = vector.broadcast %6 : vector<1x16xf32> to vector<2x16xf32>
    %140 = arith.addf %138, %139 : vector<2x16xf32>
    %141 = arith.mulf %128, %140 : vector<2x16xf32>
    %142 = arith.addf %137, %141 : vector<2x16xf32>
    %143 = math.tanh %142 : vector<2x16xf32>
    %cst_41 = arith.constant 1.000000e+00 : f32
    %144 = vector.broadcast %cst_41 : f32 to vector<2x16xf32>
    %145 = arith.subf %144, %136 : vector<2x16xf32>
    %146 = arith.mulf %145, %143 : vector<2x16xf32>
    %147 = arith.mulf %136, %75 : vector<2x16xf32>
    %148 = arith.addf %146, %147 : vector<2x16xf32>
    %149 = arith.index_cast %c1_i32 : i32 to index
    %c0_42 = arith.constant 0 : index
    %c0_43 = arith.constant 0 : index
    %150 = vector.load %arg7[%149, %c0_42, %c0_43] : memref<8x2x16xf32, #tpu.memory_space<vmem>>, vector<1x2x16xf32>
    %151 = vector.shape_cast %150 : vector<1x2x16xf32> to vector<2x16xf32>
    %152 = vector.shape_cast %120 : vector<2x16xf32> to vector<1x2x16xf32>
    tpu.vector_store %arg7[%149, %c0_42, %c0_43], %152 {strides = array<i32>} : memref<8x2x16xf32, #tpu.memory_space<vmem>>, vector<1x2x16xf32>,
    %153 = arith.index_cast %84 : i32 to index
    %c0_44 = arith.constant 0 : index
    %c0_45 = arith.constant 0 : index
    %154 = vector.load %arg8[%153, %c0_44, %c0_45] : memref<8x2x16xf32, #tpu.memory_space<vmem>>, vector<1x2x16xf32>
    %155 = vector.shape_cast %154 : vector<1x2x16xf32> to vector<2x16xf32>
    %156 = vector.shape_cast %148 : vector<2x16xf32> to vector<1x2x16xf32>
    tpu.vector_store %arg8[%153, %c0_44, %c0_45], %156 {strides = array<i32>} : memref<8x2x16xf32, #tpu.memory_space<vmem>>, vector<1x2x16xf32>,
    %c2_i32 = arith.constant 2 : i32
    %c7_i32_46 = arith.constant 7 : i32
    %157 = arith.subi %c7_i32_46, %c2_i32 : i32
    %158 = arith.index_cast %c2_i32 : i32 to index
    %c0_47 = arith.constant 0 : index
    %c0_48 = arith.constant 0 : index
    %159 = vector.load %arg1[%158, %c0_47, %c0_48] : memref<8x2x48xf32, #tpu.memory_space<vmem>>, vector<1x2x48xf32>
    %160 = vector.shape_cast %159 : vector<1x2x48xf32> to vector<2x48xf32>
    %161 = arith.index_cast %157 : i32 to index
    %c0_49 = arith.constant 0 : index
    %c0_50 = arith.constant 0 : index
    %162 = vector.load %arg2[%161, %c0_49, %c0_50] : memref<8x2x48xf32, #tpu.memory_space<vmem>>, vector<1x2x48xf32>
    %163 = vector.shape_cast %162 : vector<1x2x48xf32> to vector<2x48xf32>
    %cst_51 = arith.constant dense<0.000000e+00> : vector<2x48xf32>
    %164 = tpu.matmul %120, %3, %cst_51 {dimension_numbers = #tpu.dot_dimension_numbers<[1], [0], [0], [1], [0, 0, 1, 1], [], []>} : vector<2x16xf32>, vector<16x48xf32>, vector<2x48xf32> -> vector<2x48xf32>
    %cst_52 = arith.constant dense<0.000000e+00> : vector<2x48xf32>
    %165 = tpu.matmul %148, %4, %cst_52 {dimension_numbers = #tpu.dot_dimension_numbers<[1], [0], [0], [1], [0, 0, 1, 1], [], []>} : vector<2x16xf32>, vector<16x48xf32>, vector<2x48xf32> -> vector<2x48xf32>
    %166 = vector.extract_strided_slice %160 {offsets = [0, 0], sizes = [2, 16], strides = [1, 1]} : vector<2x48xf32> to vector<2x16xf32>
    %167 = vector.extract_strided_slice %164 {offsets = [0, 0], sizes = [2, 16], strides = [1, 1]} : vector<2x48xf32> to vector<2x16xf32>
    %168 = arith.addf %166, %167 : vector<2x16xf32>
    %169 = arith.negf %168 : vector<2x16xf32>
    %170 = math.exp %169 : vector<2x16xf32>
    %cst_53 = arith.constant 1.000000e+00 : f32
    %171 = vector.broadcast %cst_53 : f32 to vector<2x16xf32>
    %172 = arith.addf %171, %170 : vector<2x16xf32>
    %173 = arith.divf %171, %172 : vector<2x16xf32>
    %174 = vector.extract_strided_slice %160 {offsets = [0, 16], sizes = [2, 16], strides = [1, 1]} : vector<2x48xf32> to vector<2x16xf32>
    %175 = vector.extract_strided_slice %164 {offsets = [0, 16], sizes = [2, 16], strides = [1, 1]} : vector<2x48xf32> to vector<2x16xf32>
    %176 = arith.addf %174, %175 : vector<2x16xf32>
    %177 = arith.negf %176 : vector<2x16xf32>
    %178 = math.exp %177 : vector<2x16xf32>
    %cst_54 = arith.constant 1.000000e+00 : f32
    %179 = vector.broadcast %cst_54 : f32 to vector<2x16xf32>
    %180 = arith.addf %179, %178 : vector<2x16xf32>
    %181 = arith.divf %179, %180 : vector<2x16xf32>
    %182 = vector.extract_strided_slice %160 {offsets = [0, 32], sizes = [2, 16], strides = [1, 1]} : vector<2x48xf32> to vector<2x16xf32>
    %183 = vector.extract_strided_slice %164 {offsets = [0, 32], sizes = [2, 16], strides = [1, 1]} : vector<2x48xf32> to vector<2x16xf32>
    %184 = vector.broadcast %5 : vector<1x16xf32> to vector<2x16xf32>
    %185 = arith.addf %183, %184 : vector<2x16xf32>
    %186 = arith.mulf %173, %185 : vector<2x16xf32>
    %187 = arith.addf %182, %186 : vector<2x16xf32>
    %188 = math.tanh %187 : vector<2x16xf32>
    %cst_55 = arith.constant 1.000000e+00 : f32
    %189 = vector.broadcast %cst_55 : f32 to vector<2x16xf32>
    %190 = arith.subf %189, %181 : vector<2x16xf32>
    %191 = arith.mulf %190, %188 : vector<2x16xf32>
    %192 = arith.mulf %181, %120 : vector<2x16xf32>
    %193 = arith.addf %191, %192 : vector<2x16xf32>
    %194 = vector.extract_strided_slice %163 {offsets = [0, 0], sizes = [2, 16], strides = [1, 1]} : vector<2x48xf32> to vector<2x16xf32>
    %195 = vector.extract_strided_slice %165 {offsets = [0, 0], sizes = [2, 16], strides = [1, 1]} : vector<2x48xf32> to vector<2x16xf32>
    %196 = arith.addf %194, %195 : vector<2x16xf32>
    %197 = arith.negf %196 : vector<2x16xf32>
    %198 = math.exp %197 : vector<2x16xf32>
    %cst_56 = arith.constant 1.000000e+00 : f32
    %199 = vector.broadcast %cst_56 : f32 to vector<2x16xf32>
    %200 = arith.addf %199, %198 : vector<2x16xf32>
    %201 = arith.divf %199, %200 : vector<2x16xf32>
    %202 = vector.extract_strided_slice %163 {offsets = [0, 16], sizes = [2, 16], strides = [1, 1]} : vector<2x48xf32> to vector<2x16xf32>
    %203 = vector.extract_strided_slice %165 {offsets = [0, 16], sizes = [2, 16], strides = [1, 1]} : vector<2x48xf32> to vector<2x16xf32>
    %204 = arith.addf %202, %203 : vector<2x16xf32>
    %205 = arith.negf %204 : vector<2x16xf32>
    %206 = math.exp %205 : vector<2x16xf32>
    %cst_57 = arith.constant 1.000000e+00 : f32
    %207 = vector.broadcast %cst_57 : f32 to vector<2x16xf32>
    %208 = arith.addf %207, %206 : vector<2x16xf32>
    %209 = arith.divf %207, %208 : vector<2x16xf32>
    %210 = vector.extract_strided_slice %163 {offsets = [0, 32], sizes = [2, 16], strides = [1, 1]} : vector<2x48xf32> to vector<2x16xf32>
    %211 = vector.extract_strided_slice %165 {offsets = [0, 32], sizes = [2, 16], strides = [1, 1]} : vector<2x48xf32> to vector<2x16xf32>
    %212 = vector.broadcast %6 : vector<1x16xf32> to vector<2x16xf32>
    %213 = arith.addf %211, %212 : vector<2x16xf32>
    %214 = arith.mulf %201, %213 : vector<2x16xf32>
    %215 = arith.addf %210, %214 : vector<2x16xf32>
    %216 = math.tanh %215 : vector<2x16xf32>
    %cst_58 = arith.constant 1.000000e+00 : f32
    %217 = vector.broadcast %cst_58 : f32 to vector<2x16xf32>
    %218 = arith.subf %217, %209 : vector<2x16xf32>
    %219 = arith.mulf %218, %216 : vector<2x16xf32>
    %220 = arith.mulf %209, %148 : vector<2x16xf32>
    %221 = arith.addf %219, %220 : vector<2x16xf32>
    %222 = arith.index_cast %c2_i32 : i32 to index
    %c0_59 = arith.constant 0 : index
    %c0_60 = arith.constant 0 : index
    %223 = vector.load %arg7[%222, %c0_59, %c0_60] : memref<8x2x16xf32, #tpu.memory_space<vmem>>, vector<1x2x16xf32>
    %224 = vector.shape_cast %223 : vector<1x2x16xf32> to vector<2x16xf32>
    %225 = vector.shape_cast %193 : vector<2x16xf32> to vector<1x2x16xf32>
    tpu.vector_store %arg7[%222, %c0_59, %c0_60], %225 {strides = array<i32>} : memref<8x2x16xf32, #tpu.memory_space<vmem>>, vector<1x2x16xf32>,
    %226 = arith.index_cast %157 : i32 to index
    %c0_61 = arith.constant 0 : index
    %c0_62 = arith.constant 0 : index
    %227 = vector.load %arg8[%226, %c0_61, %c0_62] : memref<8x2x16xf32, #tpu.memory_space<vmem>>, vector<1x2x16xf32>
    %228 = vector.shape_cast %227 : vector<1x2x16xf32> to vector<2x16xf32>
    %229 = vector.shape_cast %221 : vector<2x16xf32> to vector<1x2x16xf32>
    tpu.vector_store %arg8[%226, %c0_61, %c0_62], %229 {strides = array<i32>} : memref<8x2x16xf32, #tpu.memory_space<vmem>>, vector<1x2x16xf32>,
    %c3_i32 = arith.constant 3 : i32
    %c7_i32_63 = arith.constant 7 : i32
    %230 = arith.subi %c7_i32_63, %c3_i32 : i32
    %231 = arith.index_cast %c3_i32 : i32 to index
    %c0_64 = arith.constant 0 : index
    %c0_65 = arith.constant 0 : index
    %232 = vector.load %arg1[%231, %c0_64, %c0_65] : memref<8x2x48xf32, #tpu.memory_space<vmem>>, vector<1x2x48xf32>
    %233 = vector.shape_cast %232 : vector<1x2x48xf32> to vector<2x48xf32>
    %234 = arith.index_cast %230 : i32 to index
    %c0_66 = arith.constant 0 : index
    %c0_67 = arith.constant 0 : index
    %235 = vector.load %arg2[%234, %c0_66, %c0_67] : memref<8x2x48xf32, #tpu.memory_space<vmem>>, vector<1x2x48xf32>
    %236 = vector.shape_cast %235 : vector<1x2x48xf32> to vector<2x48xf32>
    %cst_68 = arith.constant dense<0.000000e+00> : vector<2x48xf32>
    %237 = tpu.matmul %193, %3, %cst_68 {dimension_numbers = #tpu.dot_dimension_numbers<[1], [0], [0], [1], [0, 0, 1, 1], [], []>} : vector<2x16xf32>, vector<16x48xf32>, vector<2x48xf32> -> vector<2x48xf32>
    %cst_69 = arith.constant dense<0.000000e+00> : vector<2x48xf32>
    %238 = tpu.matmul %221, %4, %cst_69 {dimension_numbers = #tpu.dot_dimension_numbers<[1], [0], [0], [1], [0, 0, 1, 1], [], []>} : vector<2x16xf32>, vector<16x48xf32>, vector<2x48xf32> -> vector<2x48xf32>
    %239 = vector.extract_strided_slice %233 {offsets = [0, 0], sizes = [2, 16], strides = [1, 1]} : vector<2x48xf32> to vector<2x16xf32>
    %240 = vector.extract_strided_slice %237 {offsets = [0, 0], sizes = [2, 16], strides = [1, 1]} : vector<2x48xf32> to vector<2x16xf32>
    %241 = arith.addf %239, %240 : vector<2x16xf32>
    %242 = arith.negf %241 : vector<2x16xf32>
    %243 = math.exp %242 : vector<2x16xf32>
    %cst_70 = arith.constant 1.000000e+00 : f32
    %244 = vector.broadcast %cst_70 : f32 to vector<2x16xf32>
    %245 = arith.addf %244, %243 : vector<2x16xf32>
    %246 = arith.divf %244, %245 : vector<2x16xf32>
    %247 = vector.extract_strided_slice %233 {offsets = [0, 16], sizes = [2, 16], strides = [1, 1]} : vector<2x48xf32> to vector<2x16xf32>
    %248 = vector.extract_strided_slice %237 {offsets = [0, 16], sizes = [2, 16], strides = [1, 1]} : vector<2x48xf32> to vector<2x16xf32>
    %249 = arith.addf %247, %248 : vector<2x16xf32>
    %250 = arith.negf %249 : vector<2x16xf32>
    %251 = math.exp %250 : vector<2x16xf32>
    %cst_71 = arith.constant 1.000000e+00 : f32
    %252 = vector.broadcast %cst_71 : f32 to vector<2x16xf32>
    %253 = arith.addf %252, %251 : vector<2x16xf32>
    %254 = arith.divf %252, %253 : vector<2x16xf32>
    %255 = vector.extract_strided_slice %233 {offsets = [0, 32], sizes = [2, 16], strides = [1, 1]} : vector<2x48xf32> to vector<2x16xf32>
    %256 = vector.extract_strided_slice %237 {offsets = [0, 32], sizes = [2, 16], strides = [1, 1]} : vector<2x48xf32> to vector<2x16xf32>
    %257 = vector.broadcast %5 : vector<1x16xf32> to vector<2x16xf32>
    %258 = arith.addf %256, %257 : vector<2x16xf32>
    %259 = arith.mulf %246, %258 : vector<2x16xf32>
    %260 = arith.addf %255, %259 : vector<2x16xf32>
    %261 = math.tanh %260 : vector<2x16xf32>
    %cst_72 = arith.constant 1.000000e+00 : f32
    %262 = vector.broadcast %cst_72 : f32 to vector<2x16xf32>
    %263 = arith.subf %262, %254 : vector<2x16xf32>
    %264 = arith.mulf %263, %261 : vector<2x16xf32>
    %265 = arith.mulf %254, %193 : vector<2x16xf32>
    %266 = arith.addf %264, %265 : vector<2x16xf32>
    %267 = vector.extract_strided_slice %236 {offsets = [0, 0], sizes = [2, 16], strides = [1, 1]} : vector<2x48xf32> to vector<2x16xf32>
    %268 = vector.extract_strided_slice %238 {offsets = [0, 0], sizes = [2, 16], strides = [1, 1]} : vector<2x48xf32> to vector<2x16xf32>
    %269 = arith.addf %267, %268 : vector<2x16xf32>
    %270 = arith.negf %269 : vector<2x16xf32>
    %271 = math.exp %270 : vector<2x16xf32>
    %cst_73 = arith.constant 1.000000e+00 : f32
    %272 = vector.broadcast %cst_73 : f32 to vector<2x16xf32>
    %273 = arith.addf %272, %271 : vector<2x16xf32>
    %274 = arith.divf %272, %273 : vector<2x16xf32>
    %275 = vector.extract_strided_slice %236 {offsets = [0, 16], sizes = [2, 16], strides = [1, 1]} : vector<2x48xf32> to vector<2x16xf32>
    %276 = vector.extract_strided_slice %238 {offsets = [0, 16], sizes = [2, 16], strides = [1, 1]} : vector<2x48xf32> to vector<2x16xf32>
    %277 = arith.addf %275, %276 : vector<2x16xf32>
    %278 = arith.negf %277 : vector<2x16xf32>
    %279 = math.exp %278 : vector<2x16xf32>
    %cst_74 = arith.constant 1.000000e+00 : f32
    %280 = vector.broadcast %cst_74 : f32 to vector<2x16xf32>
    %281 = arith.addf %280, %279 : vector<2x16xf32>
    %282 = arith.divf %280, %281 : vector<2x16xf32>
    %283 = vector.extract_strided_slice %236 {offsets = [0, 32], sizes = [2, 16], strides = [1, 1]} : vector<2x48xf32> to vector<2x16xf32>
    %284 = vector.extract_strided_slice %238 {offsets = [0, 32], sizes = [2, 16], strides = [1, 1]} : vector<2x48xf32> to vector<2x16xf32>
    %285 = vector.broadcast %6 : vector<1x16xf32> to vector<2x16xf32>
    %286 = arith.addf %284, %285 : vector<2x16xf32>
    %287 = arith.mulf %274, %286 : vector<2x16xf32>
    %288 = arith.addf %283, %287 : vector<2x16xf32>
    %289 = math.tanh %288 : vector<2x16xf32>
    %cst_75 = arith.constant 1.000000e+00 : f32
    %290 = vector.broadcast %cst_75 : f32 to vector<2x16xf32>
    %291 = arith.subf %290, %282 : vector<2x16xf32>
    %292 = arith.mulf %291, %289 : vector<2x16xf32>
    %293 = arith.mulf %282, %221 : vector<2x16xf32>
    %294 = arith.addf %292, %293 : vector<2x16xf32>
    %295 = arith.index_cast %c3_i32 : i32 to index
    %c0_76 = arith.constant 0 : index
    %c0_77 = arith.constant 0 : index
    %296 = vector.load %arg7[%295, %c0_76, %c0_77] : memref<8x2x16xf32, #tpu.memory_space<vmem>>, vector<1x2x16xf32>
    %297 = vector.shape_cast %296 : vector<1x2x16xf32> to vector<2x16xf32>
    %298 = vector.shape_cast %266 : vector<2x16xf32> to vector<1x2x16xf32>
    tpu.vector_store %arg7[%295, %c0_76, %c0_77], %298 {strides = array<i32>} : memref<8x2x16xf32, #tpu.memory_space<vmem>>, vector<1x2x16xf32>,
    %299 = arith.index_cast %230 : i32 to index
    %c0_78 = arith.constant 0 : index
    %c0_79 = arith.constant 0 : index
    %300 = vector.load %arg8[%299, %c0_78, %c0_79] : memref<8x2x16xf32, #tpu.memory_space<vmem>>, vector<1x2x16xf32>
    %301 = vector.shape_cast %300 : vector<1x2x16xf32> to vector<2x16xf32>
    %302 = vector.shape_cast %294 : vector<2x16xf32> to vector<1x2x16xf32>
    tpu.vector_store %arg8[%299, %c0_78, %c0_79], %302 {strides = array<i32>} : memref<8x2x16xf32, #tpu.memory_space<vmem>>, vector<1x2x16xf32>,
    %c4_i32 = arith.constant 4 : i32
    %c7_i32_80 = arith.constant 7 : i32
    %303 = arith.subi %c7_i32_80, %c4_i32 : i32
    %304 = arith.index_cast %c4_i32 : i32 to index
    %c0_81 = arith.constant 0 : index
    %c0_82 = arith.constant 0 : index
    %305 = vector.load %arg1[%304, %c0_81, %c0_82] : memref<8x2x48xf32, #tpu.memory_space<vmem>>, vector<1x2x48xf32>
    %306 = vector.shape_cast %305 : vector<1x2x48xf32> to vector<2x48xf32>
    %307 = arith.index_cast %303 : i32 to index
    %c0_83 = arith.constant 0 : index
    %c0_84 = arith.constant 0 : index
    %308 = vector.load %arg2[%307, %c0_83, %c0_84] : memref<8x2x48xf32, #tpu.memory_space<vmem>>, vector<1x2x48xf32>
    %309 = vector.shape_cast %308 : vector<1x2x48xf32> to vector<2x48xf32>
    %cst_85 = arith.constant dense<0.000000e+00> : vector<2x48xf32>
    %310 = tpu.matmul %266, %3, %cst_85 {dimension_numbers = #tpu.dot_dimension_numbers<[1], [0], [0], [1], [0, 0, 1, 1], [], []>} : vector<2x16xf32>, vector<16x48xf32>, vector<2x48xf32> -> vector<2x48xf32>
    %cst_86 = arith.constant dense<0.000000e+00> : vector<2x48xf32>
    %311 = tpu.matmul %294, %4, %cst_86 {dimension_numbers = #tpu.dot_dimension_numbers<[1], [0], [0], [1], [0, 0, 1, 1], [], []>} : vector<2x16xf32>, vector<16x48xf32>, vector<2x48xf32> -> vector<2x48xf32>
    %312 = vector.extract_strided_slice %306 {offsets = [0, 0], sizes = [2, 16], strides = [1, 1]} : vector<2x48xf32> to vector<2x16xf32>
    %313 = vector.extract_strided_slice %310 {offsets = [0, 0], sizes = [2, 16], strides = [1, 1]} : vector<2x48xf32> to vector<2x16xf32>
    %314 = arith.addf %312, %313 : vector<2x16xf32>
    %315 = arith.negf %314 : vector<2x16xf32>
    %316 = math.exp %315 : vector<2x16xf32>
    %cst_87 = arith.constant 1.000000e+00 : f32
    %317 = vector.broadcast %cst_87 : f32 to vector<2x16xf32>
    %318 = arith.addf %317, %316 : vector<2x16xf32>
    %319 = arith.divf %317, %318 : vector<2x16xf32>
    %320 = vector.extract_strided_slice %306 {offsets = [0, 16], sizes = [2, 16], strides = [1, 1]} : vector<2x48xf32> to vector<2x16xf32>
    %321 = vector.extract_strided_slice %310 {offsets = [0, 16], sizes = [2, 16], strides = [1, 1]} : vector<2x48xf32> to vector<2x16xf32>
    %322 = arith.addf %320, %321 : vector<2x16xf32>
    %323 = arith.negf %322 : vector<2x16xf32>
    %324 = math.exp %323 : vector<2x16xf32>
    %cst_88 = arith.constant 1.000000e+00 : f32
    %325 = vector.broadcast %cst_88 : f32 to vector<2x16xf32>
    %326 = arith.addf %325, %324 : vector<2x16xf32>
    %327 = arith.divf %325, %326 : vector<2x16xf32>
    %328 = vector.extract_strided_slice %306 {offsets = [0, 32], sizes = [2, 16], strides = [1, 1]} : vector<2x48xf32> to vector<2x16xf32>
    %329 = vector.extract_strided_slice %310 {offsets = [0, 32], sizes = [2, 16], strides = [1, 1]} : vector<2x48xf32> to vector<2x16xf32>
    %330 = vector.broadcast %5 : vector<1x16xf32> to vector<2x16xf32>
    %331 = arith.addf %329, %330 : vector<2x16xf32>
    %332 = arith.mulf %319, %331 : vector<2x16xf32>
    %333 = arith.addf %328, %332 : vector<2x16xf32>
    %334 = math.tanh %333 : vector<2x16xf32>
    %cst_89 = arith.constant 1.000000e+00 : f32
    %335 = vector.broadcast %cst_89 : f32 to vector<2x16xf32>
    %336 = arith.subf %335, %327 : vector<2x16xf32>
    %337 = arith.mulf %336, %334 : vector<2x16xf32>
    %338 = arith.mulf %327, %266 : vector<2x16xf32>
    %339 = arith.addf %337, %338 : vector<2x16xf32>
    %340 = vector.extract_strided_slice %309 {offsets = [0, 0], sizes = [2, 16], strides = [1, 1]} : vector<2x48xf32> to vector<2x16xf32>
    %341 = vector.extract_strided_slice %311 {offsets = [0, 0], sizes = [2, 16], strides = [1, 1]} : vector<2x48xf32> to vector<2x16xf32>
    %342 = arith.addf %340, %341 : vector<2x16xf32>
    %343 = arith.negf %342 : vector<2x16xf32>
    %344 = math.exp %343 : vector<2x16xf32>
    %cst_90 = arith.constant 1.000000e+00 : f32
    %345 = vector.broadcast %cst_90 : f32 to vector<2x16xf32>
    %346 = arith.addf %345, %344 : vector<2x16xf32>
    %347 = arith.divf %345, %346 : vector<2x16xf32>
    %348 = vector.extract_strided_slice %309 {offsets = [0, 16], sizes = [2, 16], strides = [1, 1]} : vector<2x48xf32> to vector<2x16xf32>
    %349 = vector.extract_strided_slice %311 {offsets = [0, 16], sizes = [2, 16], strides = [1, 1]} : vector<2x48xf32> to vector<2x16xf32>
    %350 = arith.addf %348, %349 : vector<2x16xf32>
    %351 = arith.negf %350 : vector<2x16xf32>
    %352 = math.exp %351 : vector<2x16xf32>
    %cst_91 = arith.constant 1.000000e+00 : f32
    %353 = vector.broadcast %cst_91 : f32 to vector<2x16xf32>
    %354 = arith.addf %353, %352 : vector<2x16xf32>
    %355 = arith.divf %353, %354 : vector<2x16xf32>
    %356 = vector.extract_strided_slice %309 {offsets = [0, 32], sizes = [2, 16], strides = [1, 1]} : vector<2x48xf32> to vector<2x16xf32>
    %357 = vector.extract_strided_slice %311 {offsets = [0, 32], sizes = [2, 16], strides = [1, 1]} : vector<2x48xf32> to vector<2x16xf32>
    %358 = vector.broadcast %6 : vector<1x16xf32> to vector<2x16xf32>
    %359 = arith.addf %357, %358 : vector<2x16xf32>
    %360 = arith.mulf %347, %359 : vector<2x16xf32>
    %361 = arith.addf %356, %360 : vector<2x16xf32>
    %362 = math.tanh %361 : vector<2x16xf32>
    %cst_92 = arith.constant 1.000000e+00 : f32
    %363 = vector.broadcast %cst_92 : f32 to vector<2x16xf32>
    %364 = arith.subf %363, %355 : vector<2x16xf32>
    %365 = arith.mulf %364, %362 : vector<2x16xf32>
    %366 = arith.mulf %355, %294 : vector<2x16xf32>
    %367 = arith.addf %365, %366 : vector<2x16xf32>
    %368 = arith.index_cast %c4_i32 : i32 to index
    %c0_93 = arith.constant 0 : index
    %c0_94 = arith.constant 0 : index
    %369 = vector.load %arg7[%368, %c0_93, %c0_94] : memref<8x2x16xf32, #tpu.memory_space<vmem>>, vector<1x2x16xf32>
    %370 = vector.shape_cast %369 : vector<1x2x16xf32> to vector<2x16xf32>
    %371 = vector.shape_cast %339 : vector<2x16xf32> to vector<1x2x16xf32>
    tpu.vector_store %arg7[%368, %c0_93, %c0_94], %371 {strides = array<i32>} : memref<8x2x16xf32, #tpu.memory_space<vmem>>, vector<1x2x16xf32>,
    %372 = arith.index_cast %303 : i32 to index
    %c0_95 = arith.constant 0 : index
    %c0_96 = arith.constant 0 : index
    %373 = vector.load %arg8[%372, %c0_95, %c0_96] : memref<8x2x16xf32, #tpu.memory_space<vmem>>, vector<1x2x16xf32>
    %374 = vector.shape_cast %373 : vector<1x2x16xf32> to vector<2x16xf32>
    %375 = vector.shape_cast %367 : vector<2x16xf32> to vector<1x2x16xf32>
    tpu.vector_store %arg8[%372, %c0_95, %c0_96], %375 {strides = array<i32>} : memref<8x2x16xf32, #tpu.memory_space<vmem>>, vector<1x2x16xf32>,
    %c5_i32 = arith.constant 5 : i32
    %c7_i32_97 = arith.constant 7 : i32
    %376 = arith.subi %c7_i32_97, %c5_i32 : i32
    %377 = arith.index_cast %c5_i32 : i32 to index
    %c0_98 = arith.constant 0 : index
    %c0_99 = arith.constant 0 : index
    %378 = vector.load %arg1[%377, %c0_98, %c0_99] : memref<8x2x48xf32, #tpu.memory_space<vmem>>, vector<1x2x48xf32>
    %379 = vector.shape_cast %378 : vector<1x2x48xf32> to vector<2x48xf32>
    %380 = arith.index_cast %376 : i32 to index
    %c0_100 = arith.constant 0 : index
    %c0_101 = arith.constant 0 : index
    %381 = vector.load %arg2[%380, %c0_100, %c0_101] : memref<8x2x48xf32, #tpu.memory_space<vmem>>, vector<1x2x48xf32>
    %382 = vector.shape_cast %381 : vector<1x2x48xf32> to vector<2x48xf32>
    %cst_102 = arith.constant dense<0.000000e+00> : vector<2x48xf32>
    %383 = tpu.matmul %339, %3, %cst_102 {dimension_numbers = #tpu.dot_dimension_numbers<[1], [0], [0], [1], [0, 0, 1, 1], [], []>} : vector<2x16xf32>, vector<16x48xf32>, vector<2x48xf32> -> vector<2x48xf32>
    %cst_103 = arith.constant dense<0.000000e+00> : vector<2x48xf32>
    %384 = tpu.matmul %367, %4, %cst_103 {dimension_numbers = #tpu.dot_dimension_numbers<[1], [0], [0], [1], [0, 0, 1, 1], [], []>} : vector<2x16xf32>, vector<16x48xf32>, vector<2x48xf32> -> vector<2x48xf32>
    %385 = vector.extract_strided_slice %379 {offsets = [0, 0], sizes = [2, 16], strides = [1, 1]} : vector<2x48xf32> to vector<2x16xf32>
    %386 = vector.extract_strided_slice %383 {offsets = [0, 0], sizes = [2, 16], strides = [1, 1]} : vector<2x48xf32> to vector<2x16xf32>
    %387 = arith.addf %385, %386 : vector<2x16xf32>
    %388 = arith.negf %387 : vector<2x16xf32>
    %389 = math.exp %388 : vector<2x16xf32>
    %cst_104 = arith.constant 1.000000e+00 : f32
    %390 = vector.broadcast %cst_104 : f32 to vector<2x16xf32>
    %391 = arith.addf %390, %389 : vector<2x16xf32>
    %392 = arith.divf %390, %391 : vector<2x16xf32>
    %393 = vector.extract_strided_slice %379 {offsets = [0, 16], sizes = [2, 16], strides = [1, 1]} : vector<2x48xf32> to vector<2x16xf32>
    %394 = vector.extract_strided_slice %383 {offsets = [0, 16], sizes = [2, 16], strides = [1, 1]} : vector<2x48xf32> to vector<2x16xf32>
    %395 = arith.addf %393, %394 : vector<2x16xf32>
    %396 = arith.negf %395 : vector<2x16xf32>
    %397 = math.exp %396 : vector<2x16xf32>
    %cst_105 = arith.constant 1.000000e+00 : f32
    %398 = vector.broadcast %cst_105 : f32 to vector<2x16xf32>
    %399 = arith.addf %398, %397 : vector<2x16xf32>
    %400 = arith.divf %398, %399 : vector<2x16xf32>
    %401 = vector.extract_strided_slice %379 {offsets = [0, 32], sizes = [2, 16], strides = [1, 1]} : vector<2x48xf32> to vector<2x16xf32>
    %402 = vector.extract_strided_slice %383 {offsets = [0, 32], sizes = [2, 16], strides = [1, 1]} : vector<2x48xf32> to vector<2x16xf32>
    %403 = vector.broadcast %5 : vector<1x16xf32> to vector<2x16xf32>
    %404 = arith.addf %402, %403 : vector<2x16xf32>
    %405 = arith.mulf %392, %404 : vector<2x16xf32>
    %406 = arith.addf %401, %405 : vector<2x16xf32>
    %407 = math.tanh %406 : vector<2x16xf32>
    %cst_106 = arith.constant 1.000000e+00 : f32
    %408 = vector.broadcast %cst_106 : f32 to vector<2x16xf32>
    %409 = arith.subf %408, %400 : vector<2x16xf32>
    %410 = arith.mulf %409, %407 : vector<2x16xf32>
    %411 = arith.mulf %400, %339 : vector<2x16xf32>
    %412 = arith.addf %410, %411 : vector<2x16xf32>
    %413 = vector.extract_strided_slice %382 {offsets = [0, 0], sizes = [2, 16], strides = [1, 1]} : vector<2x48xf32> to vector<2x16xf32>
    %414 = vector.extract_strided_slice %384 {offsets = [0, 0], sizes = [2, 16], strides = [1, 1]} : vector<2x48xf32> to vector<2x16xf32>
    %415 = arith.addf %413, %414 : vector<2x16xf32>
    %416 = arith.negf %415 : vector<2x16xf32>
    %417 = math.exp %416 : vector<2x16xf32>
    %cst_107 = arith.constant 1.000000e+00 : f32
    %418 = vector.broadcast %cst_107 : f32 to vector<2x16xf32>
    %419 = arith.addf %418, %417 : vector<2x16xf32>
    %420 = arith.divf %418, %419 : vector<2x16xf32>
    %421 = vector.extract_strided_slice %382 {offsets = [0, 16], sizes = [2, 16], strides = [1, 1]} : vector<2x48xf32> to vector<2x16xf32>
    %422 = vector.extract_strided_slice %384 {offsets = [0, 16], sizes = [2, 16], strides = [1, 1]} : vector<2x48xf32> to vector<2x16xf32>
    %423 = arith.addf %421, %422 : vector<2x16xf32>
    %424 = arith.negf %423 : vector<2x16xf32>
    %425 = math.exp %424 : vector<2x16xf32>
    %cst_108 = arith.constant 1.000000e+00 : f32
    %426 = vector.broadcast %cst_108 : f32 to vector<2x16xf32>
    %427 = arith.addf %426, %425 : vector<2x16xf32>
    %428 = arith.divf %426, %427 : vector<2x16xf32>
    %429 = vector.extract_strided_slice %382 {offsets = [0, 32], sizes = [2, 16], strides = [1, 1]} : vector<2x48xf32> to vector<2x16xf32>
    %430 = vector.extract_strided_slice %384 {offsets = [0, 32], sizes = [2, 16], strides = [1, 1]} : vector<2x48xf32> to vector<2x16xf32>
    %431 = vector.broadcast %6 : vector<1x16xf32> to vector<2x16xf32>
    %432 = arith.addf %430, %431 : vector<2x16xf32>
    %433 = arith.mulf %420, %432 : vector<2x16xf32>
    %434 = arith.addf %429, %433 : vector<2x16xf32>
    %435 = math.tanh %434 : vector<2x16xf32>
    %cst_109 = arith.constant 1.000000e+00 : f32
    %436 = vector.broadcast %cst_109 : f32 to vector<2x16xf32>
    %437 = arith.subf %436, %428 : vector<2x16xf32>
    %438 = arith.mulf %437, %435 : vector<2x16xf32>
    %439 = arith.mulf %428, %367 : vector<2x16xf32>
    %440 = arith.addf %438, %439 : vector<2x16xf32>
    %441 = arith.index_cast %c5_i32 : i32 to index
    %c0_110 = arith.constant 0 : index
    %c0_111 = arith.constant 0 : index
    %442 = vector.load %arg7[%441, %c0_110, %c0_111] : memref<8x2x16xf32, #tpu.memory_space<vmem>>, vector<1x2x16xf32>
    %443 = vector.shape_cast %442 : vector<1x2x16xf32> to vector<2x16xf32>
    %444 = vector.shape_cast %412 : vector<2x16xf32> to vector<1x2x16xf32>
    tpu.vector_store %arg7[%441, %c0_110, %c0_111], %444 {strides = array<i32>} : memref<8x2x16xf32, #tpu.memory_space<vmem>>, vector<1x2x16xf32>,
    %445 = arith.index_cast %376 : i32 to index
    %c0_112 = arith.constant 0 : index
    %c0_113 = arith.constant 0 : index
    %446 = vector.load %arg8[%445, %c0_112, %c0_113] : memref<8x2x16xf32, #tpu.memory_space<vmem>>, vector<1x2x16xf32>
    %447 = vector.shape_cast %446 : vector<1x2x16xf32> to vector<2x16xf32>
    %448 = vector.shape_cast %440 : vector<2x16xf32> to vector<1x2x16xf32>
    tpu.vector_store %arg8[%445, %c0_112, %c0_113], %448 {strides = array<i32>} : memref<8x2x16xf32, #tpu.memory_space<vmem>>, vector<1x2x16xf32>,
    %c6_i32 = arith.constant 6 : i32
    %c7_i32_114 = arith.constant 7 : i32
    %449 = arith.subi %c7_i32_114, %c6_i32 : i32
    %450 = arith.index_cast %c6_i32 : i32 to index
    %c0_115 = arith.constant 0 : index
    %c0_116 = arith.constant 0 : index
    %451 = vector.load %arg1[%450, %c0_115, %c0_116] : memref<8x2x48xf32, #tpu.memory_space<vmem>>, vector<1x2x48xf32>
    %452 = vector.shape_cast %451 : vector<1x2x48xf32> to vector<2x48xf32>
    %453 = arith.index_cast %449 : i32 to index
    %c0_117 = arith.constant 0 : index
    %c0_118 = arith.constant 0 : index
    %454 = vector.load %arg2[%453, %c0_117, %c0_118] : memref<8x2x48xf32, #tpu.memory_space<vmem>>, vector<1x2x48xf32>
    %455 = vector.shape_cast %454 : vector<1x2x48xf32> to vector<2x48xf32>
    %cst_119 = arith.constant dense<0.000000e+00> : vector<2x48xf32>
    %456 = tpu.matmul %412, %3, %cst_119 {dimension_numbers = #tpu.dot_dimension_numbers<[1], [0], [0], [1], [0, 0, 1, 1], [], []>} : vector<2x16xf32>, vector<16x48xf32>, vector<2x48xf32> -> vector<2x48xf32>
    %cst_120 = arith.constant dense<0.000000e+00> : vector<2x48xf32>
    %457 = tpu.matmul %440, %4, %cst_120 {dimension_numbers = #tpu.dot_dimension_numbers<[1], [0], [0], [1], [0, 0, 1, 1], [], []>} : vector<2x16xf32>, vector<16x48xf32>, vector<2x48xf32> -> vector<2x48xf32>
    %458 = vector.extract_strided_slice %452 {offsets = [0, 0], sizes = [2, 16], strides = [1, 1]} : vector<2x48xf32> to vector<2x16xf32>
    %459 = vector.extract_strided_slice %456 {offsets = [0, 0], sizes = [2, 16], strides = [1, 1]} : vector<2x48xf32> to vector<2x16xf32>
    %460 = arith.addf %458, %459 : vector<2x16xf32>
    %461 = arith.negf %460 : vector<2x16xf32>
    %462 = math.exp %461 : vector<2x16xf32>
    %cst_121 = arith.constant 1.000000e+00 : f32
    %463 = vector.broadcast %cst_121 : f32 to vector<2x16xf32>
    %464 = arith.addf %463, %462 : vector<2x16xf32>
    %465 = arith.divf %463, %464 : vector<2x16xf32>
    %466 = vector.extract_strided_slice %452 {offsets = [0, 16], sizes = [2, 16], strides = [1, 1]} : vector<2x48xf32> to vector<2x16xf32>
    %467 = vector.extract_strided_slice %456 {offsets = [0, 16], sizes = [2, 16], strides = [1, 1]} : vector<2x48xf32> to vector<2x16xf32>
    %468 = arith.addf %466, %467 : vector<2x16xf32>
    %469 = arith.negf %468 : vector<2x16xf32>
    %470 = math.exp %469 : vector<2x16xf32>
    %cst_122 = arith.constant 1.000000e+00 : f32
    %471 = vector.broadcast %cst_122 : f32 to vector<2x16xf32>
    %472 = arith.addf %471, %470 : vector<2x16xf32>
    %473 = arith.divf %471, %472 : vector<2x16xf32>
    %474 = vector.extract_strided_slice %452 {offsets = [0, 32], sizes = [2, 16], strides = [1, 1]} : vector<2x48xf32> to vector<2x16xf32>
    %475 = vector.extract_strided_slice %456 {offsets = [0, 32], sizes = [2, 16], strides = [1, 1]} : vector<2x48xf32> to vector<2x16xf32>
    %476 = vector.broadcast %5 : vector<1x16xf32> to vector<2x16xf32>
    %477 = arith.addf %475, %476 : vector<2x16xf32>
    %478 = arith.mulf %465, %477 : vector<2x16xf32>
    %479 = arith.addf %474, %478 : vector<2x16xf32>
    %480 = math.tanh %479 : vector<2x16xf32>
    %cst_123 = arith.constant 1.000000e+00 : f32
    %481 = vector.broadcast %cst_123 : f32 to vector<2x16xf32>
    %482 = arith.subf %481, %473 : vector<2x16xf32>
    %483 = arith.mulf %482, %480 : vector<2x16xf32>
    %484 = arith.mulf %473, %412 : vector<2x16xf32>
    %485 = arith.addf %483, %484 : vector<2x16xf32>
    %486 = vector.extract_strided_slice %455 {offsets = [0, 0], sizes = [2, 16], strides = [1, 1]} : vector<2x48xf32> to vector<2x16xf32>
    %487 = vector.extract_strided_slice %457 {offsets = [0, 0], sizes = [2, 16], strides = [1, 1]} : vector<2x48xf32> to vector<2x16xf32>
    %488 = arith.addf %486, %487 : vector<2x16xf32>
    %489 = arith.negf %488 : vector<2x16xf32>
    %490 = math.exp %489 : vector<2x16xf32>
    %cst_124 = arith.constant 1.000000e+00 : f32
    %491 = vector.broadcast %cst_124 : f32 to vector<2x16xf32>
    %492 = arith.addf %491, %490 : vector<2x16xf32>
    %493 = arith.divf %491, %492 : vector<2x16xf32>
    %494 = vector.extract_strided_slice %455 {offsets = [0, 16], sizes = [2, 16], strides = [1, 1]} : vector<2x48xf32> to vector<2x16xf32>
    %495 = vector.extract_strided_slice %457 {offsets = [0, 16], sizes = [2, 16], strides = [1, 1]} : vector<2x48xf32> to vector<2x16xf32>
    %496 = arith.addf %494, %495 : vector<2x16xf32>
    %497 = arith.negf %496 : vector<2x16xf32>
    %498 = math.exp %497 : vector<2x16xf32>
    %cst_125 = arith.constant 1.000000e+00 : f32
    %499 = vector.broadcast %cst_125 : f32 to vector<2x16xf32>
    %500 = arith.addf %499, %498 : vector<2x16xf32>
    %501 = arith.divf %499, %500 : vector<2x16xf32>
    %502 = vector.extract_strided_slice %455 {offsets = [0, 32], sizes = [2, 16], strides = [1, 1]} : vector<2x48xf32> to vector<2x16xf32>
    %503 = vector.extract_strided_slice %457 {offsets = [0, 32], sizes = [2, 16], strides = [1, 1]} : vector<2x48xf32> to vector<2x16xf32>
    %504 = vector.broadcast %6 : vector<1x16xf32> to vector<2x16xf32>
    %505 = arith.addf %503, %504 : vector<2x16xf32>
    %506 = arith.mulf %493, %505 : vector<2x16xf32>
    %507 = arith.addf %502, %506 : vector<2x16xf32>
    %508 = math.tanh %507 : vector<2x16xf32>
    %cst_126 = arith.constant 1.000000e+00 : f32
    %509 = vector.broadcast %cst_126 : f32 to vector<2x16xf32>
    %510 = arith.subf %509, %501 : vector<2x16xf32>
    %511 = arith.mulf %510, %508 : vector<2x16xf32>
    %512 = arith.mulf %501, %440 : vector<2x16xf32>
    %513 = arith.addf %511, %512 : vector<2x16xf32>
    %514 = arith.index_cast %c6_i32 : i32 to index
    %c0_127 = arith.constant 0 : index
    %c0_128 = arith.constant 0 : index
    %515 = vector.load %arg7[%514, %c0_127, %c0_128] : memref<8x2x16xf32, #tpu.memory_space<vmem>>, vector<1x2x16xf32>
    %516 = vector.shape_cast %515 : vector<1x2x16xf32> to vector<2x16xf32>
    %517 = vector.shape_cast %485 : vector<2x16xf32> to vector<1x2x16xf32>
    tpu.vector_store %arg7[%514, %c0_127, %c0_128], %517 {strides = array<i32>} : memref<8x2x16xf32, #tpu.memory_space<vmem>>, vector<1x2x16xf32>,
    %518 = arith.index_cast %449 : i32 to index
    %c0_129 = arith.constant 0 : index
    %c0_130 = arith.constant 0 : index
    %519 = vector.load %arg8[%518, %c0_129, %c0_130] : memref<8x2x16xf32, #tpu.memory_space<vmem>>, vector<1x2x16xf32>
    %520 = vector.shape_cast %519 : vector<1x2x16xf32> to vector<2x16xf32>
    %521 = vector.shape_cast %513 : vector<2x16xf32> to vector<1x2x16xf32>
    tpu.vector_store %arg8[%518, %c0_129, %c0_130], %521 {strides = array<i32>} : memref<8x2x16xf32, #tpu.memory_space<vmem>>, vector<1x2x16xf32>,
    %c7_i32_131 = arith.constant 7 : i32
    %c7_i32_132 = arith.constant 7 : i32
    %522 = arith.subi %c7_i32_132, %c7_i32_131 : i32
    %523 = arith.index_cast %c7_i32_131 : i32 to index
    %c0_133 = arith.constant 0 : index
    %c0_134 = arith.constant 0 : index
    %524 = vector.load %arg1[%523, %c0_133, %c0_134] : memref<8x2x48xf32, #tpu.memory_space<vmem>>, vector<1x2x48xf32>
    %525 = vector.shape_cast %524 : vector<1x2x48xf32> to vector<2x48xf32>
    %526 = arith.index_cast %522 : i32 to index
    %c0_135 = arith.constant 0 : index
    %c0_136 = arith.constant 0 : index
    %527 = vector.load %arg2[%526, %c0_135, %c0_136] : memref<8x2x48xf32, #tpu.memory_space<vmem>>, vector<1x2x48xf32>
    %528 = vector.shape_cast %527 : vector<1x2x48xf32> to vector<2x48xf32>
    %cst_137 = arith.constant dense<0.000000e+00> : vector<2x48xf32>
    %529 = tpu.matmul %485, %3, %cst_137 {dimension_numbers = #tpu.dot_dimension_numbers<[1], [0], [0], [1], [0, 0, 1, 1], [], []>} : vector<2x16xf32>, vector<16x48xf32>, vector<2x48xf32> -> vector<2x48xf32>
    %cst_138 = arith.constant dense<0.000000e+00> : vector<2x48xf32>
    %530 = tpu.matmul %513, %4, %cst_138 {dimension_numbers = #tpu.dot_dimension_numbers<[1], [0], [0], [1], [0, 0, 1, 1], [], []>} : vector<2x16xf32>, vector<16x48xf32>, vector<2x48xf32> -> vector<2x48xf32>
    %531 = vector.extract_strided_slice %525 {offsets = [0, 0], sizes = [2, 16], strides = [1, 1]} : vector<2x48xf32> to vector<2x16xf32>
    %532 = vector.extract_strided_slice %529 {offsets = [0, 0], sizes = [2, 16], strides = [1, 1]} : vector<2x48xf32> to vector<2x16xf32>
    %533 = arith.addf %531, %532 : vector<2x16xf32>
    %534 = arith.negf %533 : vector<2x16xf32>
    %535 = math.exp %534 : vector<2x16xf32>
    %cst_139 = arith.constant 1.000000e+00 : f32
    %536 = vector.broadcast %cst_139 : f32 to vector<2x16xf32>
    %537 = arith.addf %536, %535 : vector<2x16xf32>
    %538 = arith.divf %536, %537 : vector<2x16xf32>
    %539 = vector.extract_strided_slice %525 {offsets = [0, 16], sizes = [2, 16], strides = [1, 1]} : vector<2x48xf32> to vector<2x16xf32>
    %540 = vector.extract_strided_slice %529 {offsets = [0, 16], sizes = [2, 16], strides = [1, 1]} : vector<2x48xf32> to vector<2x16xf32>
    %541 = arith.addf %539, %540 : vector<2x16xf32>
    %542 = arith.negf %541 : vector<2x16xf32>
    %543 = math.exp %542 : vector<2x16xf32>
    %cst_140 = arith.constant 1.000000e+00 : f32
    %544 = vector.broadcast %cst_140 : f32 to vector<2x16xf32>
    %545 = arith.addf %544, %543 : vector<2x16xf32>
    %546 = arith.divf %544, %545 : vector<2x16xf32>
    %547 = vector.extract_strided_slice %525 {offsets = [0, 32], sizes = [2, 16], strides = [1, 1]} : vector<2x48xf32> to vector<2x16xf32>
    %548 = vector.extract_strided_slice %529 {offsets = [0, 32], sizes = [2, 16], strides = [1, 1]} : vector<2x48xf32> to vector<2x16xf32>
    %549 = vector.broadcast %5 : vector<1x16xf32> to vector<2x16xf32>
    %550 = arith.addf %548, %549 : vector<2x16xf32>
    %551 = arith.mulf %538, %550 : vector<2x16xf32>
    %552 = arith.addf %547, %551 : vector<2x16xf32>
    %553 = math.tanh %552 : vector<2x16xf32>
    %cst_141 = arith.constant 1.000000e+00 : f32
    %554 = vector.broadcast %cst_141 : f32 to vector<2x16xf32>
    %555 = arith.subf %554, %546 : vector<2x16xf32>
    %556 = arith.mulf %555, %553 : vector<2x16xf32>
    %557 = arith.mulf %546, %485 : vector<2x16xf32>
    %558 = arith.addf %556, %557 : vector<2x16xf32>
    %559 = vector.extract_strided_slice %528 {offsets = [0, 0], sizes = [2, 16], strides = [1, 1]} : vector<2x48xf32> to vector<2x16xf32>
    %560 = vector.extract_strided_slice %530 {offsets = [0, 0], sizes = [2, 16], strides = [1, 1]} : vector<2x48xf32> to vector<2x16xf32>
    %561 = arith.addf %559, %560 : vector<2x16xf32>
    %562 = arith.negf %561 : vector<2x16xf32>
    %563 = math.exp %562 : vector<2x16xf32>
    %cst_142 = arith.constant 1.000000e+00 : f32
    %564 = vector.broadcast %cst_142 : f32 to vector<2x16xf32>
    %565 = arith.addf %564, %563 : vector<2x16xf32>
    %566 = arith.divf %564, %565 : vector<2x16xf32>
    %567 = vector.extract_strided_slice %528 {offsets = [0, 16], sizes = [2, 16], strides = [1, 1]} : vector<2x48xf32> to vector<2x16xf32>
    %568 = vector.extract_strided_slice %530 {offsets = [0, 16], sizes = [2, 16], strides = [1, 1]} : vector<2x48xf32> to vector<2x16xf32>
    %569 = arith.addf %567, %568 : vector<2x16xf32>
    %570 = arith.negf %569 : vector<2x16xf32>
    %571 = math.exp %570 : vector<2x16xf32>
    %cst_143 = arith.constant 1.000000e+00 : f32
    %572 = vector.broadcast %cst_143 : f32 to vector<2x16xf32>
    %573 = arith.addf %572, %571 : vector<2x16xf32>
    %574 = arith.divf %572, %573 : vector<2x16xf32>
    %575 = vector.extract_strided_slice %528 {offsets = [0, 32], sizes = [2, 16], strides = [1, 1]} : vector<2x48xf32> to vector<2x16xf32>
    %576 = vector.extract_strided_slice %530 {offsets = [0, 32], sizes = [2, 16], strides = [1, 1]} : vector<2x48xf32> to vector<2x16xf32>
    %577 = vector.broadcast %6 : vector<1x16xf32> to vector<2x16xf32>
    %578 = arith.addf %576, %577 : vector<2x16xf32>
    %579 = arith.mulf %566, %578 : vector<2x16xf32>
    %580 = arith.addf %575, %579 : vector<2x16xf32>
    %581 = math.tanh %580 : vector<2x16xf32>
    %cst_144 = arith.constant 1.000000e+00 : f32
    %582 = vector.broadcast %cst_144 : f32 to vector<2x16xf32>
    %583 = arith.subf %582, %574 : vector<2x16xf32>
    %584 = arith.mulf %583, %581 : vector<2x16xf32>
    %585 = arith.mulf %574, %513 : vector<2x16xf32>
    %586 = arith.addf %584, %585 : vector<2x16xf32>
    %587 = arith.index_cast %c7_i32_131 : i32 to index
    %c0_145 = arith.constant 0 : index
    %c0_146 = arith.constant 0 : index
    %588 = vector.load %arg7[%587, %c0_145, %c0_146] : memref<8x2x16xf32, #tpu.memory_space<vmem>>, vector<1x2x16xf32>
    %589 = vector.shape_cast %588 : vector<1x2x16xf32> to vector<2x16xf32>
    %590 = vector.shape_cast %558 : vector<2x16xf32> to vector<1x2x16xf32>
    tpu.vector_store %arg7[%587, %c0_145, %c0_146], %590 {strides = array<i32>} : memref<8x2x16xf32, #tpu.memory_space<vmem>>, vector<1x2x16xf32>,
    %591 = arith.index_cast %522 : i32 to index
    %c0_147 = arith.constant 0 : index
    %c0_148 = arith.constant 0 : index
    %592 = vector.load %arg8[%591, %c0_147, %c0_148] : memref<8x2x16xf32, #tpu.memory_space<vmem>>, vector<1x2x16xf32>
    %593 = vector.shape_cast %592 : vector<1x2x16xf32> to vector<2x16xf32>
    %594 = vector.shape_cast %586 : vector<2x16xf32> to vector<1x2x16xf32>
    tpu.vector_store %arg8[%591, %c0_147, %c0_148], %594 {strides = array<i32>} : memref<8x2x16xf32, #tpu.memory_space<vmem>>, vector<1x2x16xf32>,
    %c8_i32 = arith.constant 8 : i32
    %c0_149 = arith.constant 0 : index
    %c0_150 = arith.constant 0 : index
    %c0_151 = arith.constant 0 : index
    %595 = vector.load %arg9[%c0_149, %c0_150, %c0_151] : memref<2x2x16xf32, #tpu.memory_space<vmem>>, vector<1x2x16xf32>
    %596 = vector.shape_cast %595 : vector<1x2x16xf32> to vector<2x16xf32>
    %597 = vector.shape_cast %558 : vector<2x16xf32> to vector<1x2x16xf32>
    tpu.vector_store %arg9[%c0_149, %c0_150, %c0_151], %597 {strides = array<i32>} : memref<2x2x16xf32, #tpu.memory_space<vmem>>, vector<1x2x16xf32>,
    %c1_152 = arith.constant 1 : index
    %c0_153 = arith.constant 0 : index
    %c0_154 = arith.constant 0 : index
    %598 = vector.load %arg9[%c1_152, %c0_153, %c0_154] : memref<2x2x16xf32, #tpu.memory_space<vmem>>, vector<1x2x16xf32>
    %599 = vector.shape_cast %598 : vector<1x2x16xf32> to vector<2x16xf32>
    %600 = vector.shape_cast %586 : vector<2x16xf32> to vector<1x2x16xf32>
    tpu.vector_store %arg9[%c1_152, %c0_153, %c0_154], %600 {strides = array<i32>} : memref<2x2x16xf32, #tpu.memory_space<vmem>>, vector<1x2x16xf32>,
    return
  }
  func.func @transform_0(%arg0: i32) -> (i32, i32, i32) {
    %c0_i32 = arith.constant 0 : i32
    %c0_i32_0 = arith.constant 0 : i32
    %c0_i32_1 = arith.constant 0 : i32
    return %arg0, %c0_i32, %c0_i32_0 : i32, i32, i32
  }
  func.func @transform_1(%arg0: i32) -> (i32, i32, i32) {
    %c0_i32 = arith.constant 0 : i32
    %0 = arith.subi %c0_i32, %arg0 : i32
    %c0_i32_0 = arith.constant 0 : i32
    %c0_i32_1 = arith.constant 0 : i32
    %c0_i32_2 = arith.constant 0 : i32
    return %0, %c0_i32_0, %c0_i32_1 : i32, i32, i32
  }
  func.func @transform_2(%arg0: i32) -> (i32, i32) {
    %c0_i32 = arith.constant 0 : i32
    %c0_i32_0 = arith.constant 0 : i32
    %c0_i32_1 = arith.constant 0 : i32
    return %c0_i32, %c0_i32_0 : i32, i32
  }
  func.func @transform_3(%arg0: i32) -> (i32, i32) {
    %c0_i32 = arith.constant 0 : i32
    %c0_i32_0 = arith.constant 0 : i32
    %c0_i32_1 = arith.constant 0 : i32
    return %c0_i32, %c0_i32_0 : i32, i32
  }
  func.func @transform_4(%arg0: i32) -> (i32, i32) {
    %c0_i32 = arith.constant 0 : i32
    %c0_i32_0 = arith.constant 0 : i32
    %c0_i32_1 = arith.constant 0 : i32
    return %c0_i32, %c0_i32_0 : i32, i32
  }
  func.func @transform_5(%arg0: i32) -> (i32, i32) {
    %c0_i32 = arith.constant 0 : i32
    %c0_i32_0 = arith.constant 0 : i32
    %c0_i32_1 = arith.constant 0 : i32
    return %c0_i32, %c0_i32_0 : i32, i32
  }
  func.func @transform_6(%arg0: i32) -> (i32, i32, i32) {
    %c0_i32 = arith.constant 0 : i32
    %c0_i32_0 = arith.constant 0 : i32
    %c0_i32_1 = arith.constant 0 : i32
    return %arg0, %c0_i32, %c0_i32_0 : i32, i32, i32
  }
  func.func @transform_7(%arg0: i32) -> (i32, i32, i32) {
    %c0_i32 = arith.constant 0 : i32
    %0 = arith.subi %c0_i32, %arg0 : i32
    %c0_i32_0 = arith.constant 0 : i32
    %c0_i32_1 = arith.constant 0 : i32
    %c0_i32_2 = arith.constant 0 : i32
    return %0, %c0_i32_0, %c0_i32_1 : i32, i32, i32
  }
}

</mosaic_0001>

<bundles_post_ra>
// kernel: encoder_forward.2
= control target key start
LH: loop header
LB: loop body
LE: loop exit
PB: predicated region body
PF: predicated region fallthrough
CT: control target
= control target key end

     0   :  { %vm65_vm0 = vcmask 123904   ;;  %v2222_v0 = vmov 0.0|0.0   ;;  %vm2223_vm1 = vmmov 0   ;;  %v2224_v3 = vmov 0.0   ;;  %s2225_s10 = smov 32   ;;  %s2227_s15 = smov 16   ;;  %s2583_s2 = inlined_call_operand.vmem [shape: f32[16,48], index: 2, kind: input, shape index: {}]   ;;  %s2584_s3 = inlined_call_operand.vmem [shape: f32[16,48], index: 3, kind: input, shape index: {}]   ;;  %s2585_s4 = inlined_call_operand.vmem [shape: f32[1,16], index: 4, kind: input, shape index: {}]   ;;  %s2586_s5 = inlined_call_operand.vmem [shape: f32[1,16], index: 5, kind: input, shape index: {}]   ;;  %s2587_s0 = inlined_call_operand.vmem [shape: f32[8,2,48], index: 0, kind: input, shape index: {}]   ;;  %s2588_s1 = inlined_call_operand.vmem [shape: f32[8,2,48], index: 1, kind: input, shape index: {}]   ;;  %s2589_s6 = inlined_call_operand.vmem [shape: f32[8,2,16], index: 6, kind: output, shape index: {0}]   ;;  %s2590_s7 = inlined_call_operand.vmem [shape: f32[8,2,16], index: 7, kind: output, shape index: {1}]  }
   0x1   :  { %2071 = vmatprep.subr.bf16.mxu0 %v2222_v0  ;;  %v68_v1 = vld [vmem:[%s2583_s2] sm:$0xff]  ;;  %v69_v2 = vld [vmem:[%s2583_s2 + $0x8] sm:$0xff]  ;;  %1963 = vmatprep.mubr.msk.f32.mxu0 %vm2223_vm1, %v2224_v3  ;;  %66 = vst.msk [vmem:[#allocation2] sm:$0x3] %vm65_vm0, %v2224_v3  ;;  %67 = vst.msk [vmem:[#allocation2 + $0x2] sm:$0x3] %vm65_vm0, %v2224_v3 }
   0x2   :  { %v70_v4 = vld [vmem:[%s2584_s3] sm:$0xff]  ;;  %v2285_v5 = vpack.c.bf16 %v69_v2, %v68_v1  ;;  %2074 = vmatprep.subr.bf16.mxu1 %v2222_v0  ;;  %v71_v6 = vld [vmem:[%s2584_s3 + $0x8] sm:$0xff]  ;;  %1970 = vmatprep.mubr.msk.f32.mxu1 %vm2223_vm1, %v2224_v3  ;;  %vm80_vm2 = vcmask 130048   ;;  %s2226_s3 = smov 96   ;;  %s2228_s16 = smov 112  }
   0x3   :  { %v1853_v7 = vld [vmem:[%s2585_s4] ss:$0 sm:$0xff]  ;;  %v2296_v8 = vpack.c.bf16 %v71_v6, %v70_v4  ;;  %v1849_v22 = vld [vmem:[%s2588_s1 + $0xe] sm:$0x3]  ;;  %v1857_v62 = vld [vmem:[%s2587_s0 + $0x2] sm:$0x3] }
   0x4   :  { %239 = vrot.lane.b32.xlu0 %v1853_v7, %s2225_s10  ;;  %2073 = vmatpush3.bf16.msra.mxu0 %v2285_v5  ;;  %v1855_v9 = vld [vmem:[%s2586_s5] ss:$0 sm:$0xff]  ;;  %v1858_v1 = vld [vmem:[%s2588_s1 + $0xc] sm:$0x3] }
   0x5   :  { %2076 = vmatpush3.bf16.msra.mxu1 %v2296_v8  ;;  %2077 = vmatprep.subr.bf16.mxu0 %v2222_v0  ;;  %v77_v20 = vld [vmem:[%s2587_s0] sm:$0x3] }
   0x6   :  { %2080 = vmatprep.subr.bf16.mxu1 %v2222_v0 }
   0x8   :  { %277 = vrot.lane.b32.xlu0 %v1855_v9, %s2225_s10  ;;  %v74_v10 = vld [vmem:[#allocation2] sm:$0x3]  ;;  %v76_v11 = vld [vmem:[#allocation2 + $0x2] sm:$0x3] }
   0x9   :  { %1964 = vmatmul.mubr.msk.f32.vlgmr.msra.gmra.mrb[0].mxu0 %vm80_vm2, %v74_v10  ;;  %1971 = vmatmul.mubr.msk.f32.vlgmr.msra.gmra.mrb[0].mxu1 %vm80_vm2, %v76_v11 }
   0xa   :  { %2079 = vmatpush3.bf16.msra.mxu0 %v2285_v5  ;;  %1977 = vmatprep.mubr.msk.f32.mxu0 %vm2223_vm1, %v2224_v3 }
   0xb   :  { %2082 = vmatpush3.bf16.msra.mxu1 %v2296_v8  ;;  %1984 = vmatprep.mubr.msk.f32.mxu1 %vm2223_vm1, %v2224_v3 }
   0xc   :  { %2083 = vmatprep.subr.bf16.mxu0 %v2222_v0  ;;  %2086 = vmatprep.subr.bf16.mxu1 %v2222_v0 }
  0x76   :  { %v2317_v12 = vpop.permute.xlu0 %239 }
  0x7a   :  { %v2319_v13 = vpop.permute.xlu0 %277 }
  0xdc   :  { %v150_v14 = vpop.f32.mrb[0].mxu0  ;;  %v223_v15 = vpop.f32.mrb[0].mxu1 }
  0xdd   :  { %v1965_v16 = vpop.f32.mrb[1].mxu0  ;;  %v242_v17 = vadd.f32 %v2317_v12, %v150_v14  ;;  %v1972_v18 = vpop.f32.mrb[1].mxu1  ;;  %v280_v19 = vadd.f32 %v2319_v13, %v223_v15  ;;  %v227_v21 = vadd.f32 %v150_v14, %v77_v20  ;;  %v265_v24 = vadd.f32 %v1849_v22, %v223_v15 }
  0xdf   :  { %244 = vrot.lane.b32.xlu1 %v242_v17, %s2226_s3  ;;  %v1852_v23 = vmul.f32 -1.442695, %v227_v21  ;;  %v1854_v25 = vmul.f32 -1.442695, %v265_v24 }
  0xe1   :  { %2126 = vpow2.f32 %v1852_v23 }
  0xe2   :  { %2128 = vpow2.f32 %v1854_v25 }
  0xe3   :  { %282 = vrot.lane.b32.xlu1 %v280_v19, %s2226_s3 }
  0xeb   :  { %v2127_v26 = vpop.eup %2126 }
  0xec   :  { %v231_v27 = vadd.f32 1.0, %v2127_v26  ;;  %v2129_v28 = vpop.eup %2128 }
  0xed   :  { %v269_v29 = vadd.f32 1.0, %v2129_v28 }
  0xee   :  { %2130 = vrcp.f32 %v231_v27 }
  0xef   :  { %2132 = vrcp.f32 %v269_v29 }
  0xf8   :  { %v2131_v30 = vpop.eup %2130 }
  0xf9   :  { %v2133_v33 = vpop.eup %2132  ;;  %v254_v43 = vsub.f32 1.0, %v2131_v30 }
  0xfa   :  { %v292_v49 = vsub.f32 1.0, %v2133_v33 }
 0x151   :  { %v245_v31 = vpop.permute.xlu1 %244 }
 0x152   :  { %v247_v32 = vmul.f32 %v2131_v30, %v245_v31 }
 0x154   :  { %249 = vrot.lane.b32.xlu0 %v247_v32, %s2225_s10 }
 0x155   :  { %v283_v34 = vpop.permute.xlu1 %282 }
 0x156   :  { %v285_v35 = vmul.f32 %v2133_v33, %v283_v34 }
 0x158   :  { %287 = vrot.lane.b32.xlu1 %v285_v35, %s2225_s10 }
 0x15c   :  { %260 = vrot.lane.b32.xlu1 %v74_v10, %s2227_s15 }
 0x160   :  { %298 = vrot.lane.b32.xlu1 %v76_v11, %s2227_s15 }
 0x1c6   :  { %v250_v36 = vpop.permute.xlu0 %249 }
 0x1c7   :  { %v252_v37 = vadd.f32 %v250_v36, %v77_v20 }
 0x1c9   :  { %2134 = vtanh.f32 %v252_v37 }
 0x1ca   :  { %v288_v38 = vpop.permute.xlu1 %287 }
 0x1cb   :  { %v290_v39 = vadd.f32 %v1849_v22, %v288_v38 }
 0x1cd   :  { %2136 = vtanh.f32 %v290_v39 }
 0x1ce   :  { %v261_v42 = vpop.permute.xlu1 %260 }
 0x1cf   :  { %v263_v45 = vmul.f32 %v2131_v30, %v261_v42 }
 0x1d2   :  { %v299_v47 = vpop.permute.xlu1 %298 }
 0x1d3   :  { %v2135_v40 = vpop.eup %2134  ;;  %v301_v51 = vmul.f32 %v2133_v33, %v299_v47 }
 0x1d4   :  { %256 = vrot.lane.b32.xlu0 %v2135_v40, %s2228_s16 }
 0x1d7   :  { %v2137_v41 = vpop.eup %2136 }
 0x1d8   :  { %294 = vrot.lane.b32.xlu0 %v2137_v41, %s2228_s16 }
 0x246   :  { %v257_v44 = vpop.permute.xlu0 %256 }
 0x247   :  { %v259_v46 = vmul.f32 %v257_v44, %v254_v43  ;;  %v1865_v44 = vld [vmem:[%s2587_s0 + $0x4] sm:$0x3] }
 0x249   :  { %v2335_v48 = vadd.f32 %v263_v45, %v259_v46  ;;  %v1866_v46 = vld [vmem:[%s2588_s1 + $0xa] sm:$0x3] }
 0x24a   :  { %v295_v50 = vpop.permute.xlu0 %294 }
 0x24b   :  { %v297_v52 = vmul.f32 %v295_v50, %v292_v49  ;;  %304 = vrot.lane.b32.xlu0 %v2335_v48, %s2228_s16 }
 0x24d   :  { %v2339_v53 = vadd.f32 %v301_v51, %v297_v52 }
 0x24f   :  { %310 = vrot.lane.b32.xlu1 %v2339_v53, %s2228_s16 }
 0x2bd   :  { %v305_v54 = vpop.permute.xlu0 %304 }
 0x2be   :  { %308 = vst.msk [vmem:[%s2589_s6] sm:$0x3] %vm65_vm0, %v305_v54  ;;  %1978 = vmatmul.mubr.msk.f32.vlgmr.msra.gmra.mrb[2].mxu0 %vm80_vm2, %v305_v54 }
 0x2bf   :  { %2085 = vmatpush3.bf16.msra.mxu0 %v2285_v5  ;;  %1991 = vmatprep.mubr.msk.f32.mxu0 %vm2223_vm1, %v2224_v3 }
 0x2c0   :  { %2089 = vmatprep.subr.bf16.mxu0 %v2222_v0 }
 0x2c1   :  { %v311_v55 = vpop.permute.xlu1 %310 }
 0x2c2   :  { %1856 = vst.msk [vmem:[%s2590_s7 + $0xe] sm:$0x3] %vm65_vm0, %v311_v55  ;;  %1985 = vmatmul.mubr.msk.f32.vlgmr.msra.gmra.mrb[2].mxu1 %vm80_vm2, %v311_v55 }
 0x2c3   :  { %2088 = vmatpush3.bf16.msra.mxu1 %v2296_v8  ;;  %1998 = vmatprep.mubr.msk.f32.mxu1 %vm2223_vm1, %v2224_v3 }
 0x2c4   :  { %2092 = vmatprep.subr.bf16.mxu1 %v2222_v0 }
 0x391   :  { %v387_v56 = vpop.f32.mrb[2].mxu0 }
 0x392   :  { %v470_v57 = vadd.f32 %v387_v56, %v2317_v12  ;;  %v1979_v58 = vpop.f32.mrb[3].mxu0  ;;  %v463_v63 = vadd.f32 %v1857_v62, %v387_v56 }
 0x394   :  { %472 = vrot.lane.b32.xlu0 %v470_v57, %s2226_s3  ;;  %v1861_v2 = vmul.f32 -1.442695, %v463_v63 }
 0x395   :  { %v459_v59 = vpop.f32.mrb[2].mxu1 }
 0x396   :  { %v497_v60 = vadd.f32 %v459_v59, %v2319_v13  ;;  %v1986_v61 = vpop.f32.mrb[3].mxu1  ;;  %v490_v4 = vadd.f32 %v1858_v1, %v459_v59  ;;  %2138 = vpow2.f32 %v1861_v2 }
 0x398   :  { %499 = vrot.lane.b32.xlu1 %v497_v60, %s2226_s3  ;;  %v1862_v6 = vmul.f32 -1.442695, %v490_v4 }
 0x39a   :  { %2140 = vpow2.f32 %v1862_v6 }
 0x3a0   :  { %v2139_v7 = vpop.eup %2138 }
 0x3a1   :  { %v467_v9 = vadd.f32 1.0, %v2139_v7 }
 0x3a3   :  { %2142 = vrcp.f32 %v467_v9 }
 0x3a4   :  { %v2141_v10 = vpop.eup %2140 }
 0x3a5   :  { %v494_v11 = vadd.f32 1.0, %v2141_v10 }
 0x3a7   :  { %2144 = vrcp.f32 %v494_v11 }
 0x3ad   :  { %v2143_v14 = vpop.eup %2142 }
 0x3ae   :  { %v482_v26 = vsub.f32 1.0, %v2143_v14  ;;  %v488_v28 = vmul.f32 %v2143_v14, %v2335_v48 }
 0x3b1   :  { %v2145_v17 = vpop.eup %2144 }
 0x3b2   :  { %v509_v31 = vsub.f32 1.0, %v2145_v17  ;;  %v515_v33 = vmul.f32 %v2145_v17, %v2339_v53 }
 0x406   :  { %v473_v15 = vpop.permute.xlu0 %472 }
 0x407   :  { %v475_v16 = vmul.f32 %v2143_v14, %v473_v15 }
 0x409   :  { %477 = vrot.lane.b32.xlu0 %v475_v16, %s2225_s10 }
 0x40a   :  { %v500_v18 = vpop.permute.xlu1 %499 }
 0x40b   :  { %v502_v19 = vmul.f32 %v2145_v17, %v500_v18 }
 0x40d   :  { %504 = vrot.lane.b32.xlu1 %v502_v19, %s2225_s10 }
 0x47b   :  { %v478_v20 = vpop.permute.xlu0 %477 }
 0x47c   :  { %v480_v21 = vadd.f32 %v1857_v62, %v478_v20 }
 0x47e   :  { %2146 = vtanh.f32 %v480_v21 }
 0x47f   :  { %v505_v22 = vpop.permute.xlu1 %504 }
 0x480   :  { %v507_v23 = vadd.f32 %v1858_v1, %v505_v22 }
 0x482   :  { %2148 = vtanh.f32 %v507_v23 }
 0x488   :  { %v2147_v24 = vpop.eup %2146 }
 0x489   :  { %484 = vrot.lane.b32.xlu0 %v2147_v24, %s2228_s16 }
 0x48c   :  { %v2149_v25 = vpop.eup %2148 }
 0x48d   :  { %511 = vrot.lane.b32.xlu1 %v2149_v25, %s2228_s16 }
 0x4fb   :  { %v485_v27 = vpop.permute.xlu0 %484 }
 0x4fc   :  { %v487_v29 = vmul.f32 %v485_v27, %v482_v26  ;;  %v1873_v26 = vld [vmem:[%s2587_s0 + $0x6] sm:$0x3] }
 0x4fe   :  { %v489_v30 = vadd.f32 %v488_v28, %v487_v29  ;;  %v1874_v28 = vld [vmem:[%s2588_s1 + $0x8] sm:$0x3] }
 0x4ff   :  { %v512_v32 = vpop.permute.xlu1 %511 }
 0x500   :  { %v514_v34 = vmul.f32 %v512_v32, %v509_v31  ;;  %518 = vrot.lane.b32.xlu0 %v489_v30, %s2228_s16 }
 0x502   :  { %v516_v35 = vadd.f32 %v515_v33, %v514_v34 }
 0x504   :  { %524 = vrot.lane.b32.xlu1 %v516_v35, %s2228_s16 }
 0x572   :  { %v519_v36 = vpop.permute.xlu0 %518 }
 0x573   :  { %1863 = vst.msk [vmem:[%s2589_s6 + $0x2] sm:$0x3] %vm65_vm0, %v519_v36  ;;  %1992 = vmatmul.mubr.msk.f32.vlgmr.msra.gmra.mrb[4].mxu0 %vm80_vm2, %v519_v36 }
 0x574   :  { %2091 = vmatpush3.bf16.msra.mxu0 %v2285_v5  ;;  %2005 = vmatprep.mubr.msk.f32.mxu0 %vm2223_vm1, %v2224_v3 }
 0x575   :  { %2095 = vmatprep.subr.bf16.mxu0 %v2222_v0 }
 0x576   :  { %v525_v37 = vpop.permute.xlu1 %524 }
 0x577   :  { %1864 = vst.msk [vmem:[%s2590_s7 + $0xc] sm:$0x3] %vm65_vm0, %v525_v37  ;;  %1999 = vmatmul.mubr.msk.f32.vlgmr.msra.gmra.mrb[4].mxu1 %vm80_vm2, %v525_v37 }
 0x578   :  { %2094 = vmatpush3.bf16.msra.mxu1 %v2296_v8  ;;  %2012 = vmatprep.mubr.msk.f32.mxu1 %vm2223_vm1, %v2224_v3 }
 0x579   :  { %2098 = vmatprep.subr.bf16.mxu1 %v2222_v0 }
 0x646   :  { %v601_v38 = vpop.f32.mrb[4].mxu0 }
 0x647   :  { %v684_v39 = vadd.f32 %v601_v38, %v2317_v12  ;;  %v1993_v40 = vpop.f32.mrb[5].mxu0  ;;  %v677_v45 = vadd.f32 %v1865_v44, %v601_v38 }
 0x649   :  { %686 = vrot.lane.b32.xlu0 %v684_v39, %s2226_s3  ;;  %v1869_v47 = vmul.f32 -1.442695, %v677_v45 }
 0x64a   :  { %v673_v41 = vpop.f32.mrb[4].mxu1 }
 0x64b   :  { %v711_v42 = vadd.f32 %v673_v41, %v2319_v13  ;;  %v2000_v43 = vpop.f32.mrb[5].mxu1  ;;  %v704_v48 = vadd.f32 %v1866_v46, %v673_v41  ;;  %2150 = vpow2.f32 %v1869_v47 }
 0x64d   :  { %713 = vrot.lane.b32.xlu1 %v711_v42, %s2226_s3  ;;  %v1870_v49 = vmul.f32 -1.442695, %v704_v48 }
 0x64f   :  { %2152 = vpow2.f32 %v1870_v49 }
 0x655   :  { %v2151_v50 = vpop.eup %2150 }
 0x656   :  { %v681_v51 = vadd.f32 1.0, %v2151_v50 }
 0x658   :  { %2154 = vrcp.f32 %v681_v51 }
 0x659   :  { %v2153_v52 = vpop.eup %2152 }
 0x65a   :  { %v708_v53 = vadd.f32 1.0, %v2153_v52 }
 0x65c   :  { %2156 = vrcp.f32 %v708_v53 }
 0x662   :  { %v2155_v54 = vpop.eup %2154 }
 0x663   :  { %v696_v4 = vsub.f32 1.0, %v2155_v54  ;;  %v702_v7 = vmul.f32 %v2155_v54, %v489_v30 }
 0x666   :  { %v2157_v57 = vpop.eup %2156 }
 0x667   :  { %v723_v11 = vsub.f32 1.0, %v2157_v57  ;;  %v729_v15 = vmul.f32 %v2157_v57, %v516_v35 }
 0x6bb   :  { %v687_v55 = vpop.permute.xlu0 %686 }
 0x6bc   :  { %v689_v56 = vmul.f32 %v2155_v54, %v687_v55 }
 0x6be   :  { %691 = vrot.lane.b32.xlu0 %v689_v56, %s2225_s10 }
 0x6bf   :  { %v714_v58 = vpop.permute.xlu1 %713 }
 0x6c0   :  { %v716_v59 = vmul.f32 %v2157_v57, %v714_v58 }
 0x6c2   :  { %718 = vrot.lane.b32.xlu1 %v716_v59, %s2225_s10 }
 0x730   :  { %v692_v60 = vpop.permute.xlu0 %691 }
 0x731   :  { %v694_v61 = vadd.f32 %v1865_v44, %v692_v60 }
 0x733   :  { %2158 = vtanh.f32 %v694_v61 }
 0x734   :  { %v719_v62 = vpop.permute.xlu1 %718 }
 0x735   :  { %v721_v63 = vadd.f32 %v1866_v46, %v719_v62 }
 0x737   :  { %2160 = vtanh.f32 %v721_v63 }
 0x73d   :  { %v2159_v1 = vpop.eup %2158 }
 0x73e   :  { %698 = vrot.lane.b32.xlu0 %v2159_v1, %s2228_s16 }
 0x741   :  { %v2161_v2 = vpop.eup %2160 }
 0x742   :  { %725 = vrot.lane.b32.xlu1 %v2161_v2, %s2228_s16 }
 0x7b0   :  { %v699_v6 = vpop.permute.xlu0 %698 }
 0x7b1   :  { %v701_v9 = vmul.f32 %v699_v6, %v696_v4  ;;  %v1881_v4 = vld [vmem:[%s2587_s0 + $0x8] sm:$0x3] }
 0x7b3   :  { %v703_v10 = vadd.f32 %v702_v7, %v701_v9  ;;  %v1882_v7 = vld [vmem:[%s2588_s1 + $0x6] sm:$0x3] }
 0x7b4   :  { %v726_v14 = vpop.permute.xlu1 %725 }
 0x7b5   :  { %v728_v16 = vmul.f32 %v726_v14, %v723_v11  ;;  %732 = vrot.lane.b32.xlu0 %v703_v10, %s2228_s16 }
 0x7b7   :  { %v730_v17 = vadd.f32 %v729_v15, %v728_v16 }
 0x7b9   :  { %738 = vrot.lane.b32.xlu1 %v730_v17, %s2228_s16 }
 0x827   :  { %v733_v18 = vpop.permute.xlu0 %732 }
 0x828   :  { %1871 = vst.msk [vmem:[%s2589_s6 + $0x4] sm:$0x3] %vm65_vm0, %v733_v18  ;;  %2006 = vmatmul.mubr.msk.f32.vlgmr.msra.gmra.mrb[6].mxu0 %vm80_vm2, %v733_v18 }
 0x829   :  { %2097 = vmatpush3.bf16.msra.mxu0 %v2285_v5  ;;  %2019 = vmatprep.mubr.msk.f32.mxu0 %vm2223_vm1, %v2224_v3 }
 0x82a   :  { %2101 = vmatprep.subr.bf16.mxu0 %v2222_v0 }
 0x82b   :  { %v739_v19 = vpop.permute.xlu1 %738 }
 0x82c   :  { %1872 = vst.msk [vmem:[%s2590_s7 + $0xa] sm:$0x3] %vm65_vm0, %v739_v19  ;;  %2013 = vmatmul.mubr.msk.f32.vlgmr.msra.gmra.mrb[6].mxu1 %vm80_vm2, %v739_v19 }
 0x82d   :  { %2100 = vmatpush3.bf16.msra.mxu1 %v2296_v8  ;;  %2026 = vmatprep.mubr.msk.f32.mxu1 %vm2223_vm1, %v2224_v3 }
 0x82e   :  { %2104 = vmatprep.subr.bf16.mxu1 %v2222_v0 }
 0x8fb   :  { %v815_v20 = vpop.f32.mrb[6].mxu0 }
 0x8fc   :  { %v898_v21 = vadd.f32 %v815_v20, %v2317_v12  ;;  %v2007_v22 = vpop.f32.mrb[7].mxu0  ;;  %v891_v27 = vadd.f32 %v1873_v26, %v815_v20 }
 0x8fe   :  { %900 = vrot.lane.b32.xlu0 %v898_v21, %s2226_s3  ;;  %v1877_v29 = vmul.f32 -1.442695, %v891_v27 }
 0x8ff   :  { %v887_v23 = vpop.f32.mrb[6].mxu1 }
 0x900   :  { %v925_v24 = vadd.f32 %v887_v23, %v2319_v13  ;;  %v2014_v25 = vpop.f32.mrb[7].mxu1  ;;  %v918_v30 = vadd.f32 %v1874_v28, %v887_v23  ;;  %2162 = vpow2.f32 %v1877_v29 }
 0x902   :  { %927 = vrot.lane.b32.xlu1 %v925_v24, %s2226_s3  ;;  %v1878_v31 = vmul.f32 -1.442695, %v918_v30 }
 0x904   :  { %2164 = vpow2.f32 %v1878_v31 }
 0x90a   :  { %v2163_v32 = vpop.eup %2162 }
 0x90b   :  { %v895_v33 = vadd.f32 1.0, %v2163_v32 }
 0x90d   :  { %2166 = vrcp.f32 %v895_v33 }
 0x90e   :  { %v2165_v34 = vpop.eup %2164 }
 0x90f   :  { %v922_v35 = vadd.f32 1.0, %v2165_v34 }
 0x911   :  { %2168 = vrcp.f32 %v922_v35 }
 0x917   :  { %v2167_v36 = vpop.eup %2166 }
 0x918   :  { %v910_v48 = vsub.f32 1.0, %v2167_v36  ;;  %v916_v50 = vmul.f32 %v2167_v36, %v703_v10 }
 0x91b   :  { %v2169_v39 = vpop.eup %2168 }
 0x91c   :  { %v937_v53 = vsub.f32 1.0, %v2169_v39  ;;  %v943_v55 = vmul.f32 %v2169_v39, %v730_v17 }
 0x970   :  { %v901_v37 = vpop.permute.xlu0 %900 }
 0x971   :  { %v903_v38 = vmul.f32 %v2167_v36, %v901_v37 }
 0x973   :  { %905 = vrot.lane.b32.xlu0 %v903_v38, %s2225_s10 }
 0x974   :  { %v928_v40 = vpop.permute.xlu1 %927 }
 0x975   :  { %v930_v41 = vmul.f32 %v2169_v39, %v928_v40 }
 0x977   :  { %932 = vrot.lane.b32.xlu1 %v930_v41, %s2225_s10 }
 0x9e5   :  { %v906_v42 = vpop.permute.xlu0 %905 }
 0x9e6   :  { %v908_v43 = vadd.f32 %v1873_v26, %v906_v42 }
 0x9e8   :  { %2170 = vtanh.f32 %v908_v43 }
 0x9e9   :  { %v933_v44 = vpop.permute.xlu1 %932 }
 0x9ea   :  { %v935_v45 = vadd.f32 %v1874_v28, %v933_v44 }
 0x9ec   :  { %2172 = vtanh.f32 %v935_v45 }
 0x9f2   :  { %v2171_v46 = vpop.eup %2170 }
 0x9f3   :  { %912 = vrot.lane.b32.xlu0 %v2171_v46, %s2228_s16 }
 0x9f6   :  { %v2173_v47 = vpop.eup %2172 }
 0x9f7   :  { %939 = vrot.lane.b32.xlu1 %v2173_v47, %s2228_s16 }
 0xa65   :  { %v913_v49 = vpop.permute.xlu0 %912 }
 0xa66   :  { %v915_v51 = vmul.f32 %v913_v49, %v910_v48  ;;  %v1889_v48 = vld [vmem:[%s2587_s0 + $0xa] sm:$0x3] }
 0xa68   :  { %v917_v52 = vadd.f32 %v916_v50, %v915_v51 }
 0xa69   :  { %v940_v54 = vpop.permute.xlu1 %939 }
 0xa6a   :  { %v942_v56 = vmul.f32 %v940_v54, %v937_v53  ;;  %946 = vrot.lane.b32.xlu0 %v917_v52, %s2228_s16 }
 0xa6c   :  { %v944_v57 = vadd.f32 %v943_v55, %v942_v56 }
 0xa6e   :  { %952 = vrot.lane.b32.xlu1 %v944_v57, %s2228_s16 }
 0xadc   :  { %v947_v58 = vpop.permute.xlu0 %946 }
 0xadd   :  { %1879 = vst.msk [vmem:[%s2589_s6 + $0x6] sm:$0x3] %vm65_vm0, %v947_v58  ;;  %2020 = vmatmul.mubr.msk.f32.vlgmr.msra.gmra.mrb[8].mxu0 %vm80_vm2, %v947_v58 }
 0xade   :  { %2103 = vmatpush3.bf16.msra.mxu0 %v2285_v5  ;;  %2033 = vmatprep.mubr.msk.f32.mxu0 %vm2223_vm1, %v2224_v3 }
 0xadf   :  { %2107 = vmatprep.subr.bf16.mxu0 %v2222_v0 }
 0xae0   :  { %v953_v59 = vpop.permute.xlu1 %952 }
 0xae1   :  { %1880 = vst.msk [vmem:[%s2590_s7 + $0x8] sm:$0x3] %vm65_vm0, %v953_v59  ;;  %2027 = vmatmul.mubr.msk.f32.vlgmr.msra.gmra.mrb[8].mxu1 %vm80_vm2, %v953_v59 }
 0xae2   :  { %2106 = vmatpush3.bf16.msra.mxu1 %v2296_v8  ;;  %2040 = vmatprep.mubr.msk.f32.mxu1 %vm2223_vm1, %v2224_v3 }
 0xae3   :  { %2110 = vmatprep.subr.bf16.mxu1 %v2222_v0 }
 0xbb0   :  { %v1029_v60 = vpop.f32.mrb[8].mxu0 }
 0xbb1   :  { %v1112_v61 = vadd.f32 %v1029_v60, %v2317_v12  ;;  %v2021_v62 = vpop.f32.mrb[9].mxu0  ;;  %v1105_v6 = vadd.f32 %v1881_v4, %v1029_v60 }
 0xbb3   :  { %1114 = vrot.lane.b32.xlu0 %v1112_v61, %s2226_s3  ;;  %v1885_v9 = vmul.f32 -1.442695, %v1105_v6 }
 0xbb4   :  { %v1101_v63 = vpop.f32.mrb[8].mxu1 }
 0xbb5   :  { %v1139_v1 = vadd.f32 %v1101_v63, %v2319_v13  ;;  %v2028_v2 = vpop.f32.mrb[9].mxu1  ;;  %v1132_v10 = vadd.f32 %v1882_v7, %v1101_v63  ;;  %2174 = vpow2.f32 %v1885_v9 }
 0xbb7   :  { %1141 = vrot.lane.b32.xlu1 %v1139_v1, %s2226_s3  ;;  %v1886_v11 = vmul.f32 -1.442695, %v1132_v10 }
 0xbb9   :  { %2176 = vpow2.f32 %v1886_v11 }
 0xbbf   :  { %v2175_v14 = vpop.eup %2174 }
 0xbc0   :  { %v1109_v15 = vadd.f32 1.0, %v2175_v14 }
 0xbc2   :  { %2178 = vrcp.f32 %v1109_v15 }
 0xbc3   :  { %v2177_v16 = vpop.eup %2176 }
 0xbc4   :  { %v1136_v17 = vadd.f32 1.0, %v2177_v16 }
 0xbc6   :  { %2180 = vrcp.f32 %v1136_v17 }
 0xbcc   :  { %v2179_v18 = vpop.eup %2178 }
 0xbcd   :  { %v1124_v30 = vsub.f32 1.0, %v2179_v18  ;;  %v1130_v32 = vmul.f32 %v2179_v18, %v917_v52 }
 0xbd0   :  { %v2181_v21 = vpop.eup %2180 }
 0xbd1   :  { %v1151_v35 = vsub.f32 1.0, %v2181_v21  ;;  %v1157_v37 = vmul.f32 %v2181_v21, %v944_v57 }
 0xc25   :  { %v1115_v19 = vpop.permute.xlu0 %1114 }
 0xc26   :  { %v1117_v20 = vmul.f32 %v2179_v18, %v1115_v19 }
 0xc28   :  { %1119 = vrot.lane.b32.xlu0 %v1117_v20, %s2225_s10 }
 0xc29   :  { %v1142_v22 = vpop.permute.xlu1 %1141 }
 0xc2a   :  { %v1144_v23 = vmul.f32 %v2181_v21, %v1142_v22 }
 0xc2c   :  { %1146 = vrot.lane.b32.xlu1 %v1144_v23, %s2225_s10 }
 0xc9a   :  { %v1120_v24 = vpop.permute.xlu0 %1119 }
 0xc9b   :  { %v1122_v25 = vadd.f32 %v1881_v4, %v1120_v24 }
 0xc9d   :  { %2182 = vtanh.f32 %v1122_v25 }
 0xc9e   :  { %v1147_v26 = vpop.permute.xlu1 %1146 }
 0xc9f   :  { %v1149_v27 = vadd.f32 %v1882_v7, %v1147_v26 }
 0xca1   :  { %2184 = vtanh.f32 %v1149_v27 }
 0xca7   :  { %v2183_v28 = vpop.eup %2182 }
 0xca8   :  { %1126 = vrot.lane.b32.xlu0 %v2183_v28, %s2228_s16  ;;  %v1897_v28 = vld [vmem:[%s2587_s0 + $0xc] sm:$0x3] }
 0xcab   :  { %v2185_v29 = vpop.eup %2184 }
 0xcac   :  { %1153 = vrot.lane.b32.xlu1 %v2185_v29, %s2228_s16 }
 0xd1a   :  { %v1127_v31 = vpop.permute.xlu0 %1126 }
 0xd1b   :  { %v1129_v33 = vmul.f32 %v1127_v31, %v1124_v30 }
 0xd1d   :  { %v1131_v34 = vadd.f32 %v1130_v32, %v1129_v33 }
 0xd1e   :  { %v1154_v36 = vpop.permute.xlu1 %1153 }
 0xd1f   :  { %v1156_v38 = vmul.f32 %v1154_v36, %v1151_v35  ;;  %1160 = vrot.lane.b32.xlu0 %v1131_v34, %s2228_s16 }
 0xd21   :  { %v1158_v39 = vadd.f32 %v1157_v37, %v1156_v38 }
 0xd23   :  { %1166 = vrot.lane.b32.xlu1 %v1158_v39, %s2228_s16 }
 0xd91   :  { %v1161_v40 = vpop.permute.xlu0 %1160 }
 0xd92   :  { %1887 = vst.msk [vmem:[%s2589_s6 + $0x8] sm:$0x3] %vm65_vm0, %v1161_v40  ;;  %2034 = vmatmul.mubr.msk.f32.vlgmr.msra.gmra.mrb[10].mxu0 %vm80_vm2, %v1161_v40 }
 0xd93   :  { %2109 = vmatpush3.bf16.msra.mxu0 %v2285_v5  ;;  %2047 = vmatprep.mubr.msk.f32.mxu0 %vm2223_vm1, %v2224_v3 }
 0xd94   :  { %2113 = vmatprep.subr.bf16.mxu0 %v2222_v0 }
 0xd95   :  { %v1167_v41 = vpop.permute.xlu1 %1166 }
 0xd96   :  { %1888 = vst.msk [vmem:[%s2590_s7 + $0x6] sm:$0x3] %vm65_vm0, %v1167_v41  ;;  %2041 = vmatmul.mubr.msk.f32.vlgmr.msra.gmra.mrb[10].mxu1 %vm80_vm2, %v1167_v41 }
 0xd97   :  { %2112 = vmatpush3.bf16.msra.mxu1 %v2296_v8  ;;  %2054 = vmatprep.mubr.msk.f32.mxu1 %vm2223_vm1, %v2224_v3 }
 0xd98   :  { %2116 = vmatprep.subr.bf16.mxu1 %v2222_v0  ;;  %v1890_v0 = vld [vmem:[%s2588_s1 + $0x4] sm:$0x3] }
 0xe65   :  { %v1243_v42 = vpop.f32.mrb[10].mxu0 }
 0xe66   :  { %v1326_v43 = vadd.f32 %v1243_v42, %v2317_v12  ;;  %v2035_v44 = vpop.f32.mrb[11].mxu0  ;;  %v1319_v49 = vadd.f32 %v1889_v48, %v1243_v42 }
 0xe68   :  { %1328 = vrot.lane.b32.xlu0 %v1326_v43, %s2226_s3  ;;  %v1893_v50 = vmul.f32 -1.442695, %v1319_v49 }
 0xe69   :  { %v1315_v45 = vpop.f32.mrb[10].mxu1 }
 0xe6a   :  { %v1353_v46 = vadd.f32 %v1315_v45, %v2319_v13  ;;  %v2042_v47 = vpop.f32.mrb[11].mxu1  ;;  %v1346_v51 = vadd.f32 %v1890_v0, %v1315_v45  ;;  %2186 = vpow2.f32 %v1893_v50 }
 0xe6c   :  { %1355 = vrot.lane.b32.xlu1 %v1353_v46, %s2226_s3  ;;  %v1894_v52 = vmul.f32 -1.442695, %v1346_v51 }
 0xe6e   :  { %2188 = vpow2.f32 %v1894_v52 }
 0xe74   :  { %v2187_v53 = vpop.eup %2186 }
 0xe75   :  { %v1323_v54 = vadd.f32 1.0, %v2187_v53 }
 0xe77   :  { %2190 = vrcp.f32 %v1323_v54 }
 0xe78   :  { %v2189_v55 = vpop.eup %2188 }
 0xe79   :  { %v1350_v56 = vadd.f32 1.0, %v2189_v55 }
 0xe7b   :  { %2192 = vrcp.f32 %v1350_v56 }
 0xe81   :  { %v2191_v57 = vpop.eup %2190 }
 0xe82   :  { %v1338_v9 = vsub.f32 1.0, %v2191_v57  ;;  %v1344_v11 = vmul.f32 %v2191_v57, %v1131_v34 }
 0xe85   :  { %v2193_v60 = vpop.eup %2192 }
 0xe86   :  { %v1365_v16 = vsub.f32 1.0, %v2193_v60  ;;  %v1371_v18 = vmul.f32 %v2193_v60, %v1158_v39 }
 0xeda   :  { %v1329_v58 = vpop.permute.xlu0 %1328 }
 0xedb   :  { %v1331_v59 = vmul.f32 %v2191_v57, %v1329_v58 }
 0xedd   :  { %1333 = vrot.lane.b32.xlu0 %v1331_v59, %s2225_s10 }
 0xede   :  { %v1356_v61 = vpop.permute.xlu1 %1355 }
 0xedf   :  { %v1358_v62 = vmul.f32 %v2193_v60, %v1356_v61 }
 0xee1   :  { %1360 = vrot.lane.b32.xlu1 %v1358_v62, %s2225_s10 }
 0xf4f   :  { %v1334_v63 = vpop.permute.xlu0 %1333 }
 0xf50   :  { %v1336_v1 = vadd.f32 %v1889_v48, %v1334_v63 }
 0xf52   :  { %2194 = vtanh.f32 %v1336_v1 }
 0xf53   :  { %v1361_v2 = vpop.permute.xlu1 %1360 }
 0xf54   :  { %v1363_v4 = vadd.f32 %v1890_v0, %v1361_v2  ;;  %v1905_v2 = vld [vmem:[%s2587_s0 + $0xe] sm:$0x3] }
 0xf56   :  { %2196 = vtanh.f32 %v1363_v4 }
 0xf5c   :  { %v2195_v6 = vpop.eup %2194 }
 0xf5d   :  { %1340 = vrot.lane.b32.xlu0 %v2195_v6, %s2228_s16  ;;  %v1601_v6 = vld [vmem:[%s2588_s1] sm:$0x3] }
 0xf60   :  { %v2197_v7 = vpop.eup %2196 }
 0xf61   :  { %1367 = vrot.lane.b32.xlu1 %v2197_v7, %s2228_s16 }
 0xfcf   :  { %v1341_v10 = vpop.permute.xlu0 %1340 }
 0xfd0   :  { %v1343_v14 = vmul.f32 %v1341_v10, %v1338_v9 }
 0xfd2   :  { %v1345_v15 = vadd.f32 %v1344_v11, %v1343_v14 }
 0xfd3   :  { %v1368_v17 = vpop.permute.xlu1 %1367 }
 0xfd4   :  { %v1370_v19 = vmul.f32 %v1368_v17, %v1365_v16  ;;  %1374 = vrot.lane.b32.xlu0 %v1345_v15, %s2228_s16 }
 0xfd6   :  { %v1372_v20 = vadd.f32 %v1371_v18, %v1370_v19 }
 0xfd8   :  { %1380 = vrot.lane.b32.xlu1 %v1372_v20, %s2228_s16 }
0x1046   :  { %v1375_v21 = vpop.permute.xlu0 %1374 }
0x1047   :  { %1895 = vst.msk [vmem:[%s2589_s6 + $0xa] sm:$0x3] %vm65_vm0, %v1375_v21  ;;  %2048 = vmatmul.mubr.msk.f32.vlgmr.msra.gmra.mrb[12].mxu0 %vm80_vm2, %v1375_v21 }
0x1048   :  { %2115 = vmatpush3.bf16.msra.mxu0 %v2285_v5  ;;  %2061 = vmatprep.mubr.msk.f32.mxu0 %vm2223_vm1, %v2224_v3 }
0x104a   :  { %v1381_v22 = vpop.permute.xlu1 %1380 }
0x104b   :  { %1896 = vst.msk [vmem:[%s2590_s7 + $0x4] sm:$0x3] %vm65_vm0, %v1381_v22  ;;  %2055 = vmatmul.mubr.msk.f32.vlgmr.msra.gmra.mrb[12].mxu1 %vm80_vm2, %v1381_v22 }
0x104c   :  { %2118 = vmatpush3.bf16.msra.mxu1 %v2296_v8  ;;  %2068 = vmatprep.mubr.msk.f32.mxu1 %vm2223_vm1, %v2224_v3  ;;  %v1898_v3 = vld [vmem:[%s2588_s1 + $0x2] sm:$0x3] }
0x111a   :  { %v1457_v23 = vpop.f32.mrb[12].mxu0 }
0x111b   :  { %v1540_v24 = vadd.f32 %v1457_v23, %v2317_v12  ;;  %v2049_v5 = vpop.f32.mrb[13].mxu0  ;;  %v1533_v8 = vadd.f32 %v1897_v28, %v1457_v23 }
0x111d   :  { %1542 = vrot.lane.b32.xlu0 %v1540_v24, %s2226_s3  ;;  %v1901_v29 = vmul.f32 -1.442695, %v1533_v8 }
0x111e   :  { %v1529_v25 = vpop.f32.mrb[12].mxu1 }
0x111f   :  { %v1567_v26 = vadd.f32 %v1529_v25, %v2319_v13  ;;  %v2056_v27 = vpop.f32.mrb[13].mxu1  ;;  %v1560_v30 = vadd.f32 %v1898_v3, %v1529_v25  ;;  %2198 = vpow2.f32 %v1901_v29 }
0x1121   :  { %1569 = vrot.lane.b32.xlu1 %v1567_v26, %s2226_s3  ;;  %v1902_v31 = vmul.f32 -1.442695, %v1560_v30 }
0x1123   :  { %2200 = vpow2.f32 %v1902_v31 }
0x1129   :  { %v2199_v32 = vpop.eup %2198 }
0x112a   :  { %v1537_v33 = vadd.f32 1.0, %v2199_v32 }
0x112c   :  { %2202 = vrcp.f32 %v1537_v33 }
0x112d   :  { %v2201_v34 = vpop.eup %2200 }
0x112e   :  { %v1564_v35 = vadd.f32 1.0, %v2201_v34 }
0x1130   :  { %2204 = vrcp.f32 %v1564_v35 }
0x1136   :  { %v2203_v36 = vpop.eup %2202 }
0x1137   :  { %v1552_v48 = vsub.f32 1.0, %v2203_v36  ;;  %v1558_v0 = vmul.f32 %v2203_v36, %v1345_v15 }
0x113a   :  { %v2205_v39 = vpop.eup %2204 }
0x113b   :  { %v1579_v52 = vsub.f32 1.0, %v2205_v39  ;;  %v1585_v54 = vmul.f32 %v2205_v39, %v1372_v20 }
0x118f   :  { %v1543_v37 = vpop.permute.xlu0 %1542 }
0x1190   :  { %v1545_v38 = vmul.f32 %v2203_v36, %v1543_v37 }
0x1192   :  { %1547 = vrot.lane.b32.xlu0 %v1545_v38, %s2225_s10 }
0x1193   :  { %v1570_v40 = vpop.permute.xlu1 %1569 }
0x1194   :  { %v1572_v41 = vmul.f32 %v2205_v39, %v1570_v40 }
0x1196   :  { %1574 = vrot.lane.b32.xlu1 %v1572_v41, %s2225_s10 }
0x1204   :  { %v1548_v42 = vpop.permute.xlu0 %1547 }
0x1205   :  { %v1550_v43 = vadd.f32 %v1897_v28, %v1548_v42 }
0x1207   :  { %2206 = vtanh.f32 %v1550_v43 }
0x1208   :  { %v1575_v44 = vpop.permute.xlu1 %1574 }
0x1209   :  { %v1577_v45 = vadd.f32 %v1898_v3, %v1575_v44 }
0x120b   :  { %2208 = vtanh.f32 %v1577_v45 }
0x1211   :  { %v2207_v46 = vpop.eup %2206 }
0x1212   :  { %1554 = vrot.lane.b32.xlu0 %v2207_v46, %s2228_s16 }
0x1215   :  { %v2209_v47 = vpop.eup %2208 }
0x1216   :  { %1581 = vrot.lane.b32.xlu1 %v2209_v47, %s2228_s16 }
0x1284   :  { %v1555_v49 = vpop.permute.xlu0 %1554 }
0x1285   :  { %v1557_v50 = vmul.f32 %v1555_v49, %v1552_v48 }
0x1287   :  { %v1559_v51 = vadd.f32 %v1558_v0, %v1557_v50 }
0x1288   :  { %v1582_v53 = vpop.permute.xlu1 %1581 }
0x1289   :  { %v1584_v55 = vmul.f32 %v1582_v53, %v1579_v52  ;;  %1588 = vrot.lane.b32.xlu0 %v1559_v51, %s2228_s16 }
0x128b   :  { %v1586_v56 = vadd.f32 %v1585_v54, %v1584_v55 }
0x128d   :  { %1594 = vrot.lane.b32.xlu1 %v1586_v56, %s2228_s16 }
0x12fb   :  { %v1589_v57 = vpop.permute.xlu0 %1588 }
0x12fc   :  { %1903 = vst.msk [vmem:[%s2589_s6 + $0xc] sm:$0x3] %vm65_vm0, %v1589_v57  ;;  %2062 = vmatmul.mubr.msk.f32.vlgmr.msra.gmra.mrb[14].mxu0 %vm80_vm2, %v1589_v57 }
0x12ff   :  { %v1595_v58 = vpop.permute.xlu1 %1594 }
0x1300   :  { %1904 = vst.msk [vmem:[%s2590_s7 + $0x2] sm:$0x3] %vm65_vm0, %v1595_v58  ;;  %2069 = vmatmul.mubr.msk.f32.vlgmr.msra.gmra.mrb[14].mxu1 %vm80_vm2, %v1595_v58 }
0x13cf   :  { %v1670_v59 = vpop.f32.mrb[14].mxu0 }
0x13d0   :  { %v1753_v60 = vadd.f32 %v1670_v59, %v2317_v12  ;;  %v2063_v61 = vpop.f32.mrb[15].mxu0  ;;  %v1746_v4 = vadd.f32 %v1905_v2, %v1670_v59 }
0x13d2   :  { %1755 = vrot.lane.b32.xlu0 %v1753_v60, %s2226_s3  ;;  %v1908_v7 = vmul.f32 -1.442695, %v1746_v4 }
0x13d3   :  { %v1742_v62 = vpop.f32.mrb[14].mxu1 }
0x13d4   :  { %v1780_v63 = vadd.f32 %v1742_v62, %v2319_v13  ;;  %v2070_v1 = vpop.f32.mrb[15].mxu1  ;;  %v1773_v12 = vadd.f32 %v1742_v62, %v1601_v6  ;;  %2210 = vpow2.f32 %v1908_v7 }
0x13d6   :  { %1782 = vrot.lane.b32.xlu1 %v1780_v63, %s2226_s3  ;;  %v1909_v9 = vmul.f32 -1.442695, %v1773_v12 }
0x13d8   :  { %2212 = vpow2.f32 %v1909_v9 }
0x13de   :  { %v2211_v10 = vpop.eup %2210 }
0x13df   :  { %v1750_v11 = vadd.f32 1.0, %v2211_v10 }
0x13e1   :  { %2214 = vrcp.f32 %v1750_v11 }
0x13e2   :  { %v2213_v13 = vpop.eup %2212 }
0x13e3   :  { %v1777_v14 = vadd.f32 1.0, %v2213_v13 }
0x13e5   :  { %2216 = vrcp.f32 %v1777_v14 }
0x13eb   :  { %v2215_v15 = vpop.eup %2214 }
0x13ec   :  { %v1765_v26 = vsub.f32 1.0, %v2215_v15  ;;  %v1771_v28 = vmul.f32 %v2215_v15, %v1559_v51 }
0x13ef   :  { %v2217_v18 = vpop.eup %2216 }
0x13f0   :  { %v1792_v29 = vsub.f32 1.0, %v2217_v18  ;;  %v1798_v31 = vmul.f32 %v2217_v18, %v1586_v56 }
0x1444   :  { %v1756_v16 = vpop.permute.xlu0 %1755 }
0x1445   :  { %v1758_v17 = vmul.f32 %v2215_v15, %v1756_v16 }
0x1447   :  { %1760 = vrot.lane.b32.xlu0 %v1758_v17, %s2225_s10 }
0x1448   :  { %v1783_v19 = vpop.permute.xlu1 %1782 }
0x1449   :  { %v1785_v20 = vmul.f32 %v2217_v18, %v1783_v19 }
0x144b   :  { %1787 = vrot.lane.b32.xlu1 %v1785_v20, %s2225_s10 }
0x14b9   :  { %v1761_v21 = vpop.permute.xlu0 %1760 }
0x14ba   :  { %v1763_v22 = vadd.f32 %v1905_v2, %v1761_v21 }
0x14bc   :  { %2218 = vtanh.f32 %v1763_v22 }
0x14bd   :  { %v1788_v23 = vpop.permute.xlu1 %1787 }
0x14be   :  { %v1790_v24 = vadd.f32 %v1788_v23, %v1601_v6 }
0x14c0   :  { %2220 = vtanh.f32 %v1790_v24 }
0x14c6   :  { %v2219_v5 = vpop.eup %2218 }
0x14c7   :  { %1767 = vrot.lane.b32.xlu0 %v2219_v5, %s2228_s16 }
0x14ca   :  { %v2221_v25 = vpop.eup %2220 }
0x14cb   :  { %1794 = vrot.lane.b32.xlu1 %v2221_v25, %s2228_s16 }
0x1539   :  { %v1768_v27 = vpop.permute.xlu0 %1767 }
0x153a   :  { %v1770_v8 = vmul.f32 %v1768_v27, %v1765_v26 }
0x153c   :  { %v1772_v3 = vadd.f32 %v1771_v28, %v1770_v8 }
0x153d   :  { %v1795_v30 = vpop.permute.xlu1 %1794 }
0x153e   :  { %v1797_v32 = vmul.f32 %v1795_v30, %v1792_v29  ;;  %1801 = vrot.lane.b32.xlu0 %v1772_v3, %s2228_s16 }
0x1540   :  { %v1799_v33 = vadd.f32 %v1798_v31, %v1797_v32 }
0x1542   :  { %1807 = vrot.lane.b32.xlu1 %v1799_v33, %s2228_s16 }
0x15b0   :  { %v1802_v34 = vpop.permute.xlu0 %1801 }
0x15b1   :  { %1910 = vst.msk [vmem:[%s2589_s6 + $0xe] sm:$0x3] %vm65_vm0, %v1802_v34  ;;  %1811 = vst.msk [vmem:[#allocation2] sm:$0x3] %vm65_vm0, %v1802_v34 }
0x15b4   :  { %v1808_v35 = vpop.permute.xlu1 %1807 }
0x15b5   :  { %1810 = vst.msk [vmem:[%s2590_s7] sm:$0x3] %vm65_vm0, %v1808_v35  ;;  %1812 = vst.msk [vmem:[#allocation2 + $0x2] sm:$0x3] %vm65_vm0, %v1808_v35 }

</bundles_post_ra>
